<compile_context>
chip_gen: v7x
topology: tpu7x:2x2x1
jax: 0.10.0
libtpu: 0.0.40
codegen_flags: <defaults>
</compile_context>

<pallas_src>
import functools
import math

import jax
import jax.numpy as jnp
from jax.experimental import pallas as pl
from jax.experimental.pallas import tpu as pltpu


def _round_up(x, m):
    return -(-x // m) * m


# ----------------------------------------------------------------------------
# Shared in-kernel helper: channels-first 1x1 conv + ReLU.
#   x_cf : (Cin, T)   -- pixels along lanes
#   w_t  : (Cenc, Cin)
#   b    : (Cenc, 1)
# Cin is tiny (e.g. 4), so this is Cin VPU broadcast-FMAs instead of a K=4 MXU
# dot (avoids wasting MXU contraction depth).
# ----------------------------------------------------------------------------
def _conv1x1_relu_cf(x_cf, w_t, b_col):
    cin = x_cf.shape[0]
    acc = w_t[:, 0:1] * x_cf[0:1, :]
    for c in range(1, cin):
        acc = acc + w_t[:, c:c + 1] * x_cf[c:c + 1, :]
    return jnp.maximum(acc + b_col, 0.0)


# ----------------------------------------------------------------------------
# Fused kernel: encoder (1x1 conv + ReLU) + PPM, flash-style over key tiles.
# Grid = (N, Lp//tq, Lp//tk), reduction (key) axis last.
#
# Scratch (persists across the whole grid):
#   fnq_ref : (Cenc, tq) bf16  normalized query features (set once per (b, qi))
#   acc_ref : (Cout, tq) f32   y accumulator
#   fnk_ref : (Cenc, Lp) bf16  whole-image normalized key features (per b)
#   g_ref   : (Cout, Lp) bf16  whole-image PPM projection            (per b)
# The key caches are filled during the qi==0 row and reused by every later
# query row, so the encoder / rsqrt / projection run exactly once per image.
# ----------------------------------------------------------------------------
def _fused_encoder_ppm_kernel(xq_ref, xk_ref, wenc_ref, benc_ref,
                              wppm_ref, bppm_ref,
                              y_ref, base_ref,
                              fnq_ref, acc_ref, fnk_ref, g_ref,
                              *, l_actual, needs_mask):
    qi = pl.program_id(1)
    ki = pl.program_id(2)
    tk = xk_ref.shape[-1]
    off = pl.multiple_of(ki * tk, 128)

    # ---- per-(b, qi) init: query features, base output, accumulator --------
    @pl.when(ki == 0)
    def _init_query():
        feat_q = _conv1x1_relu_cf(xq_ref[0], wenc_ref[...], benc_ref[...])   # (Cenc, tq) f32
        base_ref[0] = feat_q.astype(base_ref.dtype)
        inv_q = jax.lax.rsqrt(jnp.sum(feat_q * feat_q, axis=0, keepdims=True) + 1e-12)
        fnq_ref[...] = (feat_q * inv_q).astype(fnq_ref.dtype)
        acc_ref[...] = jnp.zeros_like(acc_ref)

    # ---- per-(b) key cache fill (only during the first query row) ----------
    @pl.when(qi == 0)
    def _fill_key_cache():
        feat_k = _conv1x1_relu_cf(xk_ref[0], wenc_ref[...], benc_ref[...])   # (Cenc, tk) f32
        g_k = jnp.dot(wppm_ref[...], feat_k,
                      preferred_element_type=jnp.float32) + bppm_ref[...]    # (Cout, tk)
        inv_k = jax.lax.rsqrt(jnp.sum(feat_k * feat_k, axis=0, keepdims=True) + 1e-12)
        fn_k = feat_k * inv_k
        if needs_mask:
            # zero padded key pixels so they contribute nothing to attention
            kglob = off + jax.lax.broadcasted_iota(jnp.int32, (1, tk), 1)
            fn_k = jnp.where(kglob < l_actual, fn_k, 0.0)
        fnk_ref[:, pl.ds(off, tk)] = fn_k.astype(fnk_ref.dtype)
        g_ref[:, pl.ds(off, tk)] = g_k.astype(g_ref.dtype)

    # ---- flash-style accumulation over key tiles ----------------------------
    fn_k = fnk_ref[:, pl.ds(off, tk)]                                        # (Cenc, tk) bf16
    g_k = g_ref[:, pl.ds(off, tk)]                                           # (Cout, tk) bf16

    # s[j, i] = fn_k[:, j] . fn_q[:, i] -- contraction over channels, bf16 MXU
    s = jax.lax.dot_general(fn_k, fnq_ref[...],
                            (((0,), (0,)), ((), ())),
                            preferred_element_type=jnp.float32)              # (tk, tq) f32
    p = jnp.maximum(s, 0.0).astype(jnp.bfloat16)
    p = p * p                                                                # gamma = 2 (bf16 VALU)
    acc_ref[...] += jnp.dot(g_k, p, preferred_element_type=jnp.float32)      # (Cout, tq) f32

    @pl.when(ki == pl.num_programs(2) - 1)
    def _finalize():
        y_ref[0] = acc_ref[...].astype(y_ref.dtype)


def _plan_ppm_tiles(L):
    """Returns (tq, tk, Lp): query/key tile widths and padded pixel count."""
    Lp = _round_up(L, 128)
    if Lp <= 512:
        # single padded tile; grid is (N, 1, 1)
        return Lp, Lp, Lp
    # 256-aligned tiles for the v6e/v7x 256-wide MXU; big tq for lane-dense
    # stores / MXU N-dim, smaller tk keeps the transient (tk, tq) s tile small.
    tq, tk = 512, 256
    Lp = _round_up(L, tq)           # tq is a multiple of tk
    return tq, tk, Lp


def encoder_ppm_fused(x_ncl, w_enc_t, b_enc_col, w_ppm_t, b_ppm_col):
    """x_ncl: (N, Cin, L) channels-first flattened pixels.
    Returns (y, base) channels-first: (N, Cout, L), (N, Cenc, L)."""
    N, Cin, L = x_ncl.shape
    Cenc = w_enc_t.shape[0]
    Cout = w_ppm_t.shape[0]
    tq, tk, Lp = _plan_ppm_tiles(L)
    xp = x_ncl if Lp == L else jnp.pad(x_ncl, ((0, 0), (0, 0), (0, Lp - L)))
    grid = (N, Lp // tq, Lp // tk)

    kernel = functools.partial(_fused_encoder_ppm_kernel,
                               l_actual=L, needs_mask=(Lp != L))

    # xk only has to be streamed during the qi==0 cache-fill row; for qi > 0
    # the block index collapses to 0 so Pallas skips the redundant HBM re-read.
    def xk_map(b, qi, ki):
        return (b, 0, jnp.where(qi == 0, ki, 0))

    # Whole-image bf16 caches cost (Cenc + Cout) * Lp * 2 bytes (~4 MiB at
    # Lp = 16384) -- well within the default scoped VMEM. Only raise the limit
    # when the caches get big; keep it <= 48 MiB so it also fits v7x (64 MiB).
    cache_bytes = (Cenc + Cout) * Lp * 2
    cp_kwargs = {}
    if cache_bytes > (16 << 20):
        cp_kwargs["vmem_limit_bytes"] = int(min(48 << 20, cache_bytes * 2 + (8 << 20)))

    y, base = pl.pallas_call(
        kernel,
        out_shape=(jax.ShapeDtypeStruct((N, Cout, Lp), jnp.float32),
                   jax.ShapeDtypeStruct((N, Cenc, Lp), jnp.float32)),
        grid_spec=pltpu.PrefetchScalarGridSpec(
            num_scalar_prefetch=0,
            grid=grid,
            in_specs=[
                pl.BlockSpec((1, Cin, tq), lambda b, qi, ki: (b, 0, qi)),   # query pixels
                pl.BlockSpec((1, Cin, tk), xk_map),                         # key pixels
                pl.BlockSpec((Cenc, Cin), lambda b, qi, ki: (0, 0)),        # encoder weight
                pl.BlockSpec((Cenc, 1), lambda b, qi, ki: (0, 0)),          # encoder bias
                pl.BlockSpec((Cout, Cenc), lambda b, qi, ki: (0, 0)),       # ppm weight
                pl.BlockSpec((Cout, 1), lambda b, qi, ki: (0, 0)),          # ppm bias
            ],
            out_specs=(
                pl.BlockSpec((1, Cout, tq), lambda b, qi, ki: (b, 0, qi)),  # y
                pl.BlockSpec((1, Cenc, tq), lambda b, qi, ki: (b, 0, qi)),  # base
            ),
            scratch_shapes=[
                pltpu.VMEM((Cenc, tq), jnp.bfloat16),   # fn_q (bf16 MXU operand)
                pltpu.VMEM((Cout, tq), jnp.float32),    # y accumulator
                pltpu.VMEM((Cenc, Lp), jnp.bfloat16),   # whole-image fn cache
                pltpu.VMEM((Cout, Lp), jnp.bfloat16),   # whole-image g  cache
            ],
        ),
        # qi MUST stay sequential ("arbitrary"): key caches are filled during
        # the qi==0 row and reused by later query rows. Only the batch axis is
        # megacore-parallel.
        # TODO(synk): for N == 1 on v7x this leaves one TensorCore idle.
        compiler_params=pltpu.CompilerParams(
            dimension_semantics=("parallel", "arbitrary", "arbitrary"),
            **cp_kwargs),
    )(xp, xp, w_enc_t, b_enc_col, w_ppm_t, b_ppm_col)
    if Lp != L:
        y, base = y[..., :L], base[..., :L]
    return y, base


# ----------------------------------------------------------------------------
# Moment-encoder forward: channels-first 1x1 conv + ReLU only (memory-bound).
# ----------------------------------------------------------------------------
def _encoder_kernel(x_ref, wt_ref, b_ref, o_ref):
    o_ref[0] = _conv1x1_relu_cf(x_ref[0], wt_ref[...], b_ref[...]).astype(o_ref.dtype)


def _pick_enc_tile(Lp, cap=8192):
    t = min(Lp, cap)
    t -= t % 128
    t = max(t, 128)
    while Lp % t:
        t -= 128
    return t


def encoder_forward(x_ncl, w_t, b_col):
    N, Cin, L = x_ncl.shape
    Cenc = w_t.shape[0]
    Lp = _round_up(L, 128)
    xp = x_ncl if Lp == L else jnp.pad(x_ncl, ((0, 0), (0, 0), (0, Lp - L)))
    t = _pick_enc_tile(Lp)
    grid = (N, Lp // t)
    out = pl.pallas_call(
        _encoder_kernel,
        out_shape=jax.ShapeDtypeStruct((N, Cenc, Lp), jnp.float32),
        grid_spec=pltpu.PrefetchScalarGridSpec(
            num_scalar_prefetch=0,
            grid=grid,
            in_specs=[
                pl.BlockSpec((1, Cin, t), lambda b, i: (b, 0, i)),
                pl.BlockSpec((Cenc, Cin), lambda b, i: (0, 0)),
                pl.BlockSpec((Cenc, 1), lambda b, i: (0, 0)),
            ],
            out_specs=pl.BlockSpec((1, Cenc, t), lambda b, i: (b, 0, i)),
        ),
        compiler_params=pltpu.CompilerParams(
            dimension_semantics=("parallel", "parallel")),
    )(xp, w_t, b_col)
    return out if Lp == L else out[..., :L]


# ----------------------------------------------------------------------------
# CLLD module
# ----------------------------------------------------------------------------
class CLLDPallas:
    def __init__(self, in_channels=4, enc_channels=32, ppm_out_channels=32,
                 encoder_momentum=0.99, num_epochs=100, seed=0):
        key = jax.random.PRNGKey(seed)
        k1, k2, k3, k4 = jax.random.split(key, 4)
        # weights stored channels-first (Cout, Cin) so kernels stay lane-dense
        self.w_base_t = 0.1 * jax.random.normal(k1, (enc_channels, in_channels), jnp.float32)
        self.b_base = 0.1 * jax.random.normal(k2, (enc_channels, 1), jnp.float32)
        # moment encoder starts as an exact copy (as in the PyTorch __init__)
        self.w_mom_t = self.w_base_t
        self.b_mom = self.b_base
        # PPM transform (1x1 conv) params
        self.w_ppm_t = 0.1 * jax.random.normal(k3, (ppm_out_channels, enc_channels), jnp.float32)
        self.b_ppm = 0.1 * jax.random.normal(k4, (ppm_out_channels, 1), jnp.float32)

        self.moment = float(encoder_momentum)
        self.moment_iter = 0
        self.num_epochs = num_epochs

    def _momentum_update(self):
        # plain jnp: ~160 floats, a Pallas launch here is pure fixed overhead.
        m = self.moment
        self.w_mom_t = self.w_mom_t * m + self.w_base_t * (1.0 - m)
        self.b_mom = self.b_mom * m + self.b_base * (1.0 - m)

    def _momentum_scaling(self):
        self.moment += math.sin(math.pi / 2 * self.moment_iter / self.num_epochs) \
                       * (1.0 - self.moment)
        self.moment_iter += 1

    def __call__(self, view_1, view_2):
        N, C, H, W = view_1.shape
        L = H * W
        # NCHW -> (N, C, L): pure reshape, no transpose
        x1 = view_1.reshape(N, C, L)
        x2 = view_2.reshape(N, C, L)

        # base = base_encoder(view_1); y = ppm(base)   (single fused kernel)
        y_cf, base_cf = encoder_ppm_fused(x1, self.w_base_t, self.b_base,
                                          self.w_ppm_t, self.b_ppm)

        # no-grad branch: momentum update + moment-encoder forward
        self._momentum_update()
        yprime_cf = encoder_forward(x2, self.w_mom_t, self.b_mom)
        self._momentum_scaling()

        # channels-first (N, C, L) -> NCHW (N, C, H, W): pure reshape
        Cout = y_cf.shape[1]
        Cenc = base_cf.shape[1]
        return (y_cf.reshape(N, Cout, H, W),
                yprime_cf.reshape(N, Cenc, H, W),
                base_cf.reshape(N, Cenc, H, W))


# ----------------------------------------------------------------------------
# main: build deterministic inputs, run once, verify against a pure-JAX ref
# ----------------------------------------------------------------------------
def _ref_encoder(x_ncl, w_t, b_col):
    return jnp.maximum(jnp.einsum("ec,ncl->nel", w_t, x_ncl) + b_col[None], 0.0)


def _ref_forward(x_ncl, w_t, b_col, wp_t, bp_col):
    feat = _ref_encoder(x_ncl, w_t, b_col)                                     # (N, Cenc, L)
    g = jnp.einsum("oe,nel->nol", wp_t, feat) + bp_col[None]                   # (N, Cout, L)
    fn = feat * jax.lax.rsqrt(jnp.sum(feat * feat, axis=1, keepdims=True) + 1e-12)
    sim = jnp.maximum(jnp.einsum("nei,nej->nij", fn, fn), 0.0) ** 2            # (N, L, L)
    y = jnp.einsum("nij,noj->noi", sim, g)                                     # (N, Cout, L)
    return y, feat


if __name__ == "__main__":
    key = jax.random.PRNGKey(0)
    k1, k2 = jax.random.split(key)
    view_1 = jax.random.normal(k1, (2, 4, 16, 16), jnp.float32)  # NCHW
    view_2 = jax.random.normal(k2, (2, 4, 16, 16), jnp.float32)  # NCHW

    model = CLLDPallas(in_channels=4, enc_channels=32, ppm_out_channels=32,
                       encoder_momentum=0.99, num_epochs=100, seed=0)
    y, y_prime, base = model(view_1, view_2)
    jax.block_until_ready((y, y_prime, base))

    assert y.shape == (2, 32, 16, 16)
    assert y_prime.shape == (2, 32, 16, 16)
    assert base.shape == (2, 32, 16, 16)

    # numerical check against a pure-JAX reference
    N, C, H, W = view_1.shape
    x1 = view_1.reshape(N, C, H * W)
    x2 = view_2.reshape(N, C, H * W)
    y_ref, base_ref = _ref_forward(x1, model.w_base_t, model.b_base,
                                   model.w_ppm_t, model.b_ppm)
    yp_ref = _ref_encoder(x2, model.w_mom_t, model.b_mom)

    # base / y_prime are pure-f32 paths -> tight tolerance
    assert jnp.allclose(base, base_ref.reshape(N, -1, H, W), rtol=1e-3, atol=1e-3)
    assert jnp.allclose(y_prime, yp_ref.reshape(N, -1, H, W), rtol=1e-3, atol=1e-3)
    # y uses bf16 MXU operands with f32 accumulation (flash-attention precision
    # pattern) -> check normalized max error against a looser bound.
    y_ref_n = y_ref.reshape(N, -1, H, W)
    rel_err = jnp.max(jnp.abs(y - y_ref_n)) / jnp.max(jnp.abs(y_ref_n))
    assert rel_err < 2e-2, f"y relative error too large: {rel_err}"

    print("KERNEL_OK")
</pallas_src>

<mosaic_0001>
module attributes {stable_mosaic.version = 11 : i64} {
  func.func @_fused_encoder_ppm_kernel(%arg0: i32, %arg1: i32, %arg2: i32, %arg3: memref<1x4x256xf32, #tpu.memory_space<vmem>>, %arg4: memref<1x4x256xf32, #tpu.memory_space<vmem>>, %arg5: memref<32x4xf32, #tpu.memory_space<vmem>>, %arg6: memref<32x1xf32, #tpu.memory_space<vmem>>, %arg7: memref<32x32xf32, #tpu.memory_space<vmem>>, %arg8: memref<32x1xf32, #tpu.memory_space<vmem>>, %arg9: memref<1x32x256xf32, #tpu.memory_space<vmem>>, %arg10: memref<1x32x256xf32, #tpu.memory_space<vmem>>, %arg11: memref<32x256xbf16, #tpu.memory_space<vmem>>, %arg12: memref<32x256xf32, #tpu.memory_space<vmem>>, %arg13: memref<32x256xbf16, #tpu.memory_space<vmem>>, %arg14: memref<32x256xbf16, #tpu.memory_space<vmem>>) attributes {dimension_semantics = [#tpu.dimension_semantics<parallel>, #tpu.dimension_semantics<arbitrary>, #tpu.dimension_semantics<arbitrary>], iteration_bounds = array<i64: 2, 1, 1>, scalar_prefetch = 0 : i64, scratch_operands = 4 : i64, tpu.core_type = #tpu.core_type<tc>, window_params = [{transform_indices = @transform_0, window_bounds = array<i64: 1, 4, 256>}, {transform_indices = @transform_1, window_bounds = array<i64: 1, 4, 256>}, {pipeline_mode = #tpu.pipeline_mode<synchronous>, transform_indices = @transform_2, window_bounds = array<i64: 32, 4>}, {pipeline_mode = #tpu.pipeline_mode<synchronous>, transform_indices = @transform_3, window_bounds = array<i64: 32, 1>}, {pipeline_mode = #tpu.pipeline_mode<synchronous>, transform_indices = @transform_4, window_bounds = array<i64: 32, 32>}, {pipeline_mode = #tpu.pipeline_mode<synchronous>, transform_indices = @transform_5, window_bounds = array<i64: 32, 1>}, {transform_indices = @transform_6, window_bounds = array<i64: 1, 32, 256>}, {transform_indices = @transform_7, window_bounds = array<i64: 1, 32, 256>}]} {
    %c256_i32 = arith.constant 256 : i32
    %0 = arith.muli %arg2, %c256_i32 : i32
    %1 = tpu.assume_multiple %0, 128 : i32
    %c0_i32 = arith.constant 0 : i32
    %2 = arith.cmpi eq, %arg2, %c0_i32 : i32
    %3 = arith.extui %2 : i1 to i32
    %c0_i32_0 = arith.constant 0 : i32
    %4 = arith.cmpi ne, %3, %c0_i32_0 : i32
    scf.if %4 {
      %c0_14 = arith.constant 0 : index
      %c0_15 = arith.constant 0 : index
      %c0_16 = arith.constant 0 : index
      %25 = vector.load %arg3[%c0_14, %c0_15, %c0_16] : memref<1x4x256xf32, #tpu.memory_space<vmem>>, vector<1x4x256xf32>
      %26 = vector.shape_cast %25 : vector<1x4x256xf32> to vector<4x256xf32>
      %c0_17 = arith.constant 0 : index
      %c0_18 = arith.constant 0 : index
      %27 = vector.load %arg5[%c0_17, %c0_18] : memref<32x4xf32, #tpu.memory_space<vmem>>, vector<32x4xf32>
      %c0_19 = arith.constant 0 : index
      %c0_20 = arith.constant 0 : index
      %28 = vector.load %arg6[%c0_19, %c0_20] : memref<32x1xf32, #tpu.memory_space<vmem>>, vector<32x1xf32>
      %29 = vector.extract_strided_slice %27 {offsets = [0, 0], sizes = [32, 1], strides = [1, 1]} : vector<32x4xf32> to vector<32x1xf32>
      %30 = vector.extract_strided_slice %26 {offsets = [0, 0], sizes = [1, 256], strides = [1, 1]} : vector<4x256xf32> to vector<1x256xf32>
      %31 = vector.broadcast %29 : vector<32x1xf32> to vector<32x256xf32>
      %32 = vector.broadcast %30 : vector<1x256xf32> to vector<32x256xf32>
      %33 = arith.mulf %31, %32 : vector<32x256xf32>
      %34 = vector.extract_strided_slice %27 {offsets = [0, 1], sizes = [32, 1], strides = [1, 1]} : vector<32x4xf32> to vector<32x1xf32>
      %35 = vector.extract_strided_slice %26 {offsets = [1, 0], sizes = [1, 256], strides = [1, 1]} : vector<4x256xf32> to vector<1x256xf32>
      %36 = vector.broadcast %34 : vector<32x1xf32> to vector<32x256xf32>
      %37 = vector.broadcast %35 : vector<1x256xf32> to vector<32x256xf32>
      %38 = arith.mulf %36, %37 : vector<32x256xf32>
      %39 = arith.addf %33, %38 : vector<32x256xf32>
      %40 = vector.extract_strided_slice %27 {offsets = [0, 2], sizes = [32, 1], strides = [1, 1]} : vector<32x4xf32> to vector<32x1xf32>
      %41 = vector.extract_strided_slice %26 {offsets = [2, 0], sizes = [1, 256], strides = [1, 1]} : vector<4x256xf32> to vector<1x256xf32>
      %42 = vector.broadcast %40 : vector<32x1xf32> to vector<32x256xf32>
      %43 = vector.broadcast %41 : vector<1x256xf32> to vector<32x256xf32>
      %44 = arith.mulf %42, %43 : vector<32x256xf32>
      %45 = arith.addf %39, %44 : vector<32x256xf32>
      %46 = vector.extract_strided_slice %27 {offsets = [0, 3], sizes = [32, 1], strides = [1, 1]} : vector<32x4xf32> to vector<32x1xf32>
      %47 = vector.extract_strided_slice %26 {offsets = [3, 0], sizes = [1, 256], strides = [1, 1]} : vector<4x256xf32> to vector<1x256xf32>
      %48 = vector.broadcast %46 : vector<32x1xf32> to vector<32x256xf32>
      %49 = vector.broadcast %47 : vector<1x256xf32> to vector<32x256xf32>
      %50 = arith.mulf %48, %49 : vector<32x256xf32>
      %51 = arith.addf %45, %50 : vector<32x256xf32>
      %52 = vector.broadcast %28 : vector<32x1xf32> to vector<32x256xf32>
      %53 = arith.addf %51, %52 : vector<32x256xf32>
      %cst_21 = arith.constant 0.000000e+00 : f32
      %54 = vector.broadcast %cst_21 : f32 to vector<32x256xf32>
      %55 = arith.maximumf %53, %54 : vector<32x256xf32>
      %c0_22 = arith.constant 0 : index
      %c0_23 = arith.constant 0 : index
      %c0_24 = arith.constant 0 : index
      %56 = vector.load %arg10[%c0_22, %c0_23, %c0_24] : memref<1x32x256xf32, #tpu.memory_space<vmem>>, vector<1x32x256xf32>
      %57 = vector.shape_cast %56 : vector<1x32x256xf32> to vector<32x256xf32>
      %58 = vector.shape_cast %55 : vector<32x256xf32> to vector<1x32x256xf32>
      tpu.vector_store %arg10[%c0_22, %c0_23, %c0_24], %58 {strides = array<i32>} : memref<1x32x256xf32, #tpu.memory_space<vmem>>, vector<1x32x256xf32>,
      %59 = arith.mulf %55, %55 : vector<32x256xf32>
      %cst_25 = arith.constant dense<0.000000e+00> : vector<256xf32>
      %60 = vector.multi_reduction <add>, %59, %cst_25 [0] : vector<32x256xf32> to vector<256xf32>
      %61 = vector.shape_cast %60 : vector<256xf32> to vector<1x256xf32>
      %cst_26 = arith.constant 9.99999996E-13 : f32
      %62 = vector.broadcast %cst_26 : f32 to vector<1x256xf32>
      %63 = arith.addf %61, %62 : vector<1x256xf32>
      %64 = math.rsqrt %63 : vector<1x256xf32>
      %65 = vector.broadcast %64 : vector<1x256xf32> to vector<32x256xf32>
      %66 = arith.mulf %55, %65 : vector<32x256xf32>
      %67 = arith.truncf %66 : vector<32x256xf32> to vector<32x256xbf16>
      %c0_27 = arith.constant 0 : index
      %c0_28 = arith.constant 0 : index
      %68 = vector.load %arg11[%c0_27, %c0_28] : memref<32x256xbf16, #tpu.memory_space<vmem>>, vector<32x256xbf16>
      tpu.vector_store %arg11[%c0_27, %c0_28], %67 {strides = array<i32>} : memref<32x256xbf16, #tpu.memory_space<vmem>>, vector<32x256xbf16>,
      %cst_29 = arith.constant 0.000000e+00 : f32
      %69 = vector.broadcast %cst_29 : f32 to vector<32x256xf32>
      %c0_30 = arith.constant 0 : index
      %c0_31 = arith.constant 0 : index
      %70 = vector.load %arg12[%c0_30, %c0_31] : memref<32x256xf32, #tpu.memory_space<vmem>>, vector<32x256xf32>
      tpu.vector_store %arg12[%c0_30, %c0_31], %69 {strides = array<i32>} : memref<32x256xf32, #tpu.memory_space<vmem>>, vector<32x256xf32>,
    } else {
    }
    %c0_i32_1 = arith.constant 0 : i32
    %5 = arith.cmpi eq, %arg1, %c0_i32_1 : i32
    %6 = arith.extui %5 : i1 to i32
    %c0_i32_2 = arith.constant 0 : i32
    %7 = arith.cmpi ne, %6, %c0_i32_2 : i32
    scf.if %7 {
      %c0_14 = arith.constant 0 : index
      %c0_15 = arith.constant 0 : index
      %c0_16 = arith.constant 0 : index
      %25 = vector.load %arg4[%c0_14, %c0_15, %c0_16] : memref<1x4x256xf32, #tpu.memory_space<vmem>>, vector<1x4x256xf32>
      %26 = vector.shape_cast %25 : vector<1x4x256xf32> to vector<4x256xf32>
      %c0_17 = arith.constant 0 : index
      %c0_18 = arith.constant 0 : index
      %27 = vector.load %arg5[%c0_17, %c0_18] : memref<32x4xf32, #tpu.memory_space<vmem>>, vector<32x4xf32>
      %c0_19 = arith.constant 0 : index
      %c0_20 = arith.constant 0 : index
      %28 = vector.load %arg6[%c0_19, %c0_20] : memref<32x1xf32, #tpu.memory_space<vmem>>, vector<32x1xf32>
      %29 = vector.extract_strided_slice %27 {offsets = [0, 0], sizes = [32, 1], strides = [1, 1]} : vector<32x4xf32> to vector<32x1xf32>
      %30 = vector.extract_strided_slice %26 {offsets = [0, 0], sizes = [1, 256], strides = [1, 1]} : vector<4x256xf32> to vector<1x256xf32>
      %31 = vector.broadcast %29 : vector<32x1xf32> to vector<32x256xf32>
      %32 = vector.broadcast %30 : vector<1x256xf32> to vector<32x256xf32>
      %33 = arith.mulf %31, %32 : vector<32x256xf32>
      %34 = vector.extract_strided_slice %27 {offsets = [0, 1], sizes = [32, 1], strides = [1, 1]} : vector<32x4xf32> to vector<32x1xf32>
      %35 = vector.extract_strided_slice %26 {offsets = [1, 0], sizes = [1, 256], strides = [1, 1]} : vector<4x256xf32> to vector<1x256xf32>
      %36 = vector.broadcast %34 : vector<32x1xf32> to vector<32x256xf32>
      %37 = vector.broadcast %35 : vector<1x256xf32> to vector<32x256xf32>
      %38 = arith.mulf %36, %37 : vector<32x256xf32>
      %39 = arith.addf %33, %38 : vector<32x256xf32>
      %40 = vector.extract_strided_slice %27 {offsets = [0, 2], sizes = [32, 1], strides = [1, 1]} : vector<32x4xf32> to vector<32x1xf32>
      %41 = vector.extract_strided_slice %26 {offsets = [2, 0], sizes = [1, 256], strides = [1, 1]} : vector<4x256xf32> to vector<1x256xf32>
      %42 = vector.broadcast %40 : vector<32x1xf32> to vector<32x256xf32>
      %43 = vector.broadcast %41 : vector<1x256xf32> to vector<32x256xf32>
      %44 = arith.mulf %42, %43 : vector<32x256xf32>
      %45 = arith.addf %39, %44 : vector<32x256xf32>
      %46 = vector.extract_strided_slice %27 {offsets = [0, 3], sizes = [32, 1], strides = [1, 1]} : vector<32x4xf32> to vector<32x1xf32>
      %47 = vector.extract_strided_slice %26 {offsets = [3, 0], sizes = [1, 256], strides = [1, 1]} : vector<4x256xf32> to vector<1x256xf32>
      %48 = vector.broadcast %46 : vector<32x1xf32> to vector<32x256xf32>
      %49 = vector.broadcast %47 : vector<1x256xf32> to vector<32x256xf32>
      %50 = arith.mulf %48, %49 : vector<32x256xf32>
      %51 = arith.addf %45, %50 : vector<32x256xf32>
      %52 = vector.broadcast %28 : vector<32x1xf32> to vector<32x256xf32>
      %53 = arith.addf %51, %52 : vector<32x256xf32>
      %cst_21 = arith.constant 0.000000e+00 : f32
      %54 = vector.broadcast %cst_21 : f32 to vector<32x256xf32>
      %55 = arith.maximumf %53, %54 : vector<32x256xf32>
      %c0_22 = arith.constant 0 : index
      %c0_23 = arith.constant 0 : index
      %56 = vector.load %arg7[%c0_22, %c0_23] : memref<32x32xf32, #tpu.memory_space<vmem>>, vector<32x32xf32>
      %cst_24 = arith.constant dense<0.000000e+00> : vector<32x256xf32>
      %57 = tpu.matmul %56, %55, %cst_24 {dimension_numbers = #tpu.dot_dimension_numbers<[1], [0], [0], [1], [0, 0, 1, 1], [], []>} : vector<32x32xf32>, vector<32x256xf32>, vector<32x256xf32> -> vector<32x256xf32>
      %c0_25 = arith.constant 0 : index
      %c0_26 = arith.constant 0 : index
      %58 = vector.load %arg8[%c0_25, %c0_26] : memref<32x1xf32, #tpu.memory_space<vmem>>, vector<32x1xf32>
      %59 = vector.broadcast %58 : vector<32x1xf32> to vector<32x256xf32>
      %60 = arith.addf %57, %59 : vector<32x256xf32>
      %61 = arith.mulf %55, %55 : vector<32x256xf32>
      %cst_27 = arith.constant dense<0.000000e+00> : vector<256xf32>
      %62 = vector.multi_reduction <add>, %61, %cst_27 [0] : vector<32x256xf32> to vector<256xf32>
      %63 = vector.shape_cast %62 : vector<256xf32> to vector<1x256xf32>
      %cst_28 = arith.constant 9.99999996E-13 : f32
      %64 = vector.broadcast %cst_28 : f32 to vector<1x256xf32>
      %65 = arith.addf %63, %64 : vector<1x256xf32>
      %66 = math.rsqrt %65 : vector<1x256xf32>
      %67 = vector.broadcast %66 : vector<1x256xf32> to vector<32x256xf32>
      %68 = arith.mulf %55, %67 : vector<32x256xf32>
      %69 = arith.truncf %68 : vector<32x256xf32> to vector<32x256xbf16>
      %c0_29 = arith.constant 0 : index
      %70 = arith.index_cast %1 : i32 to index
      %71 = vector.load %arg13[%c0_29, %70] : memref<32x256xbf16, #tpu.memory_space<vmem>>, vector<32x256xbf16>
      tpu.vector_store %arg13[%c0_29, %70], %69 {strides = array<i32>} : memref<32x256xbf16, #tpu.memory_space<vmem>>, vector<32x256xbf16>,
      %72 = arith.truncf %60 : vector<32x256xf32> to vector<32x256xbf16>
      %c0_30 = arith.constant 0 : index
      %73 = arith.index_cast %1 : i32 to index
      %74 = vector.load %arg14[%c0_30, %73] : memref<32x256xbf16, #tpu.memory_space<vmem>>, vector<32x256xbf16>
      tpu.vector_store %arg14[%c0_30, %73], %72 {strides = array<i32>} : memref<32x256xbf16, #tpu.memory_space<vmem>>, vector<32x256xbf16>,
    } else {
    }
    %c0 = arith.constant 0 : index
    %8 = arith.index_cast %1 : i32 to index
    %9 = vector.load %arg13[%c0, %8] : memref<32x256xbf16, #tpu.memory_space<vmem>>, vector<32x256xbf16>
    %c0_3 = arith.constant 0 : index
    %10 = arith.index_cast %1 : i32 to index
    %11 = vector.load %arg14[%c0_3, %10] : memref<32x256xbf16, #tpu.memory_space<vmem>>, vector<32x256xbf16>
    %c0_4 = arith.constant 0 : index
    %c0_5 = arith.constant 0 : index
    %12 = vector.load %arg11[%c0_4, %c0_5] : memref<32x256xbf16, #tpu.memory_space<vmem>>, vector<32x256xbf16>
    %cst = arith.constant dense<0.000000e+00> : vector<256x256xf32>
    %13 = tpu.matmul %9, %12, %cst {dimension_numbers = #tpu.dot_dimension_numbers<[0], [0], [1], [1], [0, 1, 1, 1], [], []>} : vector<32x256xbf16>, vector<32x256xbf16>, vector<256x256xf32> -> vector<256x256xf32>
    %cst_6 = arith.constant 0.000000e+00 : f32
    %14 = vector.broadcast %cst_6 : f32 to vector<256x256xf32>
    %15 = arith.maximumf %13, %14 : vector<256x256xf32>
    %16 = arith.truncf %15 : vector<256x256xf32> to vector<256x256xbf16>
    %17 = arith.mulf %16, %16 : vector<256x256xbf16>
    %c0_7 = arith.constant 0 : index
    %c0_8 = arith.constant 0 : index
    %18 = vector.load %arg12[%c0_7, %c0_8] : memref<32x256xf32, #tpu.memory_space<vmem>>, vector<32x256xf32>
    %cst_9 = arith.constant dense<0.000000e+00> : vector<32x256xf32>
    %19 = tpu.matmul %11, %17, %cst_9 {dimension_numbers = #tpu.dot_dimension_numbers<[1], [0], [0], [1], [0, 0, 1, 1], [], []>} : vector<32x256xbf16>, vector<256x256xbf16>, vector<32x256xf32> -> vector<32x256xf32>
    %20 = arith.addf %18, %19 : vector<32x256xf32>
    %c0_10 = arith.constant 0 : index
    %c0_11 = arith.constant 0 : index
    %21 = vector.load %arg12[%c0_10, %c0_11] : memref<32x256xf32, #tpu.memory_space<vmem>>, vector<32x256xf32>
    tpu.vector_store %arg12[%c0_10, %c0_11], %20 {strides = array<i32>} : memref<32x256xf32, #tpu.memory_space<vmem>>, vector<32x256xf32>,
    %c0_i32_12 = arith.constant 0 : i32
    %22 = arith.cmpi eq, %arg2, %c0_i32_12 : i32
    %23 = arith.extui %22 : i1 to i32
    %c0_i32_13 = arith.constant 0 : i32
    %24 = arith.cmpi ne, %23, %c0_i32_13 : i32
    scf.if %24 {
      %c0_14 = arith.constant 0 : index
      %c0_15 = arith.constant 0 : index
      %25 = vector.load %arg12[%c0_14, %c0_15] : memref<32x256xf32, #tpu.memory_space<vmem>>, vector<32x256xf32>
      %c0_16 = arith.constant 0 : index
      %c0_17 = arith.constant 0 : index
      %c0_18 = arith.constant 0 : index
      %26 = vector.load %arg9[%c0_16, %c0_17, %c0_18] : memref<1x32x256xf32, #tpu.memory_space<vmem>>, vector<1x32x256xf32>
      %27 = vector.shape_cast %26 : vector<1x32x256xf32> to vector<32x256xf32>
      %28 = vector.shape_cast %25 : vector<32x256xf32> to vector<1x32x256xf32>
      tpu.vector_store %arg9[%c0_16, %c0_17, %c0_18], %28 {strides = array<i32>} : memref<1x32x256xf32, #tpu.memory_space<vmem>>, vector<1x32x256xf32>,
    } else {
    }
    return
  }
  func.func @transform_0(%arg0: i32, %arg1: i32, %arg2: i32) -> (i32, i32, i32) {
    %c0_i32 = arith.constant 0 : i32
    %c0_i32_0 = arith.constant 0 : i32
    return %arg0, %c0_i32, %arg1 : i32, i32, i32
  }
  func.func @transform_1(%arg0: i32, %arg1: i32, %arg2: i32) -> (i32, i32, i32) {
    %c0_i32 = arith.constant 0 : i32
    %0 = arith.cmpi eq, %arg1, %c0_i32 : i32
    %c0_i32_0 = arith.constant 0 : i32
    %1 = arith.select %0, %arg2, %c0_i32_0 : i32
    %c0_i32_1 = arith.constant 0 : i32
    %c0_i32_2 = arith.constant 0 : i32
    return %arg0, %c0_i32_1, %1 : i32, i32, i32
  }
  func.func @transform_2(%arg0: i32, %arg1: i32, %arg2: i32) -> (i32, i32) {
    %c0_i32 = arith.constant 0 : i32
    %c0_i32_0 = arith.constant 0 : i32
    %c0_i32_1 = arith.constant 0 : i32
    return %c0_i32, %c0_i32_0 : i32, i32
  }
  func.func @transform_3(%arg0: i32, %arg1: i32, %arg2: i32) -> (i32, i32) {
    %c0_i32 = arith.constant 0 : i32
    %c0_i32_0 = arith.constant 0 : i32
    %c0_i32_1 = arith.constant 0 : i32
    return %c0_i32, %c0_i32_0 : i32, i32
  }
  func.func @transform_4(%arg0: i32, %arg1: i32, %arg2: i32) -> (i32, i32) {
    %c0_i32 = arith.constant 0 : i32
    %c0_i32_0 = arith.constant 0 : i32
    %c0_i32_1 = arith.constant 0 : i32
    return %c0_i32, %c0_i32_0 : i32, i32
  }
  func.func @transform_5(%arg0: i32, %arg1: i32, %arg2: i32) -> (i32, i32) {
    %c0_i32 = arith.constant 0 : i32
    %c0_i32_0 = arith.constant 0 : i32
    %c0_i32_1 = arith.constant 0 : i32
    return %c0_i32, %c0_i32_0 : i32, i32
  }
  func.func @transform_6(%arg0: i32, %arg1: i32, %arg2: i32) -> (i32, i32, i32) {
    %c0_i32 = arith.constant 0 : i32
    %c0_i32_0 = arith.constant 0 : i32
    return %arg0, %c0_i32, %arg1 : i32, i32, i32
  }
  func.func @transform_7(%arg0: i32, %arg1: i32, %arg2: i32) -> (i32, i32, i32) {
    %c0_i32 = arith.constant 0 : i32
    %c0_i32_0 = arith.constant 0 : i32
    return %arg0, %c0_i32, %arg1 : i32, i32, i32
  }
}

</mosaic_0001>

<bundles_post_ra>
// kernel: tpu_custom_call.1
= control target key start
LH: loop header
LB: loop body
LE: loop exit
PB: predicated region body
PF: predicated region fallthrough
CT: control target
= control target key end

     0   :  { %13 = vsyncpa [#allocation7], 0  ;;  %s2665_s0 = inlined_call_operand.vmem [shape: f32[2,4,256], index: 0, kind: input, shape index: {}]   ;;  %s2666_s1 = inlined_call_operand.vmem [shape: f32[2,4,256], index: 1, kind: input, shape index: {}]   ;;  %s2667_s2 = inlined_call_operand.vmem [shape: f32[32,4], index: 2, kind: input, shape index: {}]   ;;  %s2668_s3 = inlined_call_operand.vmem [shape: f32[32,1], index: 3, kind: input, shape index: {}]   ;;  %s2669_s4 = inlined_call_operand.vmem [shape: f32[32,32], index: 4, kind: input, shape index: {}]   ;;  %s2670_s5 = inlined_call_operand.vmem [shape: f32[32,1], index: 5, kind: input, shape index: {}]   ;;  %s2671_s6 = inlined_call_operand.hbm [shape: f32[2,32,256], index: 6, kind: output, shape index: {0}]   ;;  %s2672_s7 = inlined_call_operand.hbm [shape: f32[2,32,256], index: 7, kind: output, shape index: {1}]  }
   0x1   :  { %15 = vsyncpa [#allocation7 + $0x1], 0 }
   0x2   :  { %16 = vsyncpa [#allocation9], 0 }
   0x3   :  { %18 = vsyncpa [#allocation9 + $0x1], 0  ;;  %s2134_s24 = smov 0   ;;  %s2136_s25 = smov 0  }
   0x4   :  { %s2138_s26 = smov 0   ;;  %s2140_s27 = smov 0  }
   0x5   :  { %s2142_s28 = smov 0   ;;  %s2144_s29 = smov 0  }
   0x6 LB: > { %s1823_s30 = sadd.s32 4294967295, %s2083_s29   ;;  %s1824_s8 = sadd.s32 4294967294, %s2083_s29   ;;  %s2083_s29 = sphi %s2144_s29, %s24_s29   ;;  %s2079_s28 = sphi %s2142_s28, %s2683_s28   ;;  %s2075_s27 = sphi %s2140_s27, %s2682_s27   ;;  %s2071_s26 = sphi %s2138_s26, %s2681_s26   ;;  %s2067_s25 = sphi %s2136_s25, %s2680_s25   ;;  %s2063_s24 = sphi %s2134_s24, %s2679_s24  }
   0x7   : > { %s43_s9 = sadd.s32 1, %s2079_s28  ;;  %s196_s10 = sadd.s32 1, %s2071_s26 }
   0x8   : > { %p45_p0 = scmp.ge.s32.totalorder %s43_s9, 2  ;;  %p206_p1 = scmp.ne.s32.totalorder %s2071_s26, %s2067_s25 }
   0x9   : > { %p207_p2 = scmp.eq.s32.totalorder %s1823_s30, 1  ;;  %p212_p3 = scmp.ne.s32.totalorder %s2067_s25, %s2063_s24 }
   0xa   : > { %s2685_s9 = smov (%p45_p0, %s43_s9), 0  ;;  %p213_p5 = scmp.eq.s32.totalorder %s1824_s8, 1 }
   0xb   : > { %p2174_p4 = por %p207_p2, %p206_p1  ;;  %s191_s12 = ssub.s32 %s2079_s28, %s2685_s9 }
   0xc   : > { %p1827_p6 = scmp.ge.s32.totalorder %s2083_s29, 1  ;;  %p194_p7 = scmp.eq.s32.totalorder %s191_s12, 0 }
   0xd   : > { %p2181_p8 = por %p213_p5, %p212_p3  ;;  %p301_p9 = scmp.lt.s32.totalorder %s2083_s29, 3 }
   0xe   : > { %s2187_s14 = scalar_select %p194_p7, %s2071_s26, %s196_s10  }
   0xf   : > { %p302_p10 = pnand %p1827_p6, %p301_p9 }
  0x10   : > { %v2192_v0 = vld [vmem:[%s2667_s2] sm:$0xff] (!%p302_p10)  ;;  %v2085_v1 = vmov (!%p302_p10), 2   ;;  %v2086_v2 = vmov (!%p302_p10), 1   ;;  %v695_v3 = vld [vmem:[%s2667_s2 + $0x8] sm:$0xff] (!%p302_p10)  ;;  %v2087_v4 = vmov (!%p302_p10), 0   ;;  %v2088_v5 = vmov (!%p302_p10), 3  }
  0x11   : > { %305 = sbr.rel (%p302_p10) target bundleno = 920 (0x398), region = 44  ;;  %1942 = vset.pattern.permute.xlu0 (!%p302_p10), %v2085_v1  ;;  %1941 = vset.pattern.permute.xlu1 (!%p302_p10), %v2086_v2  ;;  %v696_v6 = vld [vmem:[%s2667_s2 + $0x10] sm:$0xff] (!%p302_p10)  ;;  %v697_v7 = vld [vmem:[%s2667_s2 + $0x18] sm:$0xff] (!%p302_p10)  ;;  %v699_v8 = vld [vmem:[%s2668_s3 + $0x8] sm:$0xff] (!%p302_p10)  ;;  %v2089_v12 = vmov (!%p302_p10), 0.0   ;;  %p354_p11 = scmp.lt.s32.totalorder (!%p302_p10), %s2075_s27, 1  ;;  %v415_v19 = vlaneseq (!%p302_p10) }
  0x12   : > { %800 = vperm.xlu0 (!%p302_p10), %1942, %v2192_v0   ;;  %750 = vperm.xlu1 (!%p302_p10), %1941, %v2192_v0   ;;  %v698_v9 = vld [vmem:[%s2668_s3] sm:$0xff] (!%p302_p10)  ;;  %v700_v10 = vld [vmem:[%s2668_s3 + $0x10] sm:$0xff] (!%p302_p10)  ;;  %v701_v11 = vld [vmem:[%s2668_s3 + $0x18] sm:$0xff] (!%p302_p10)  ;;  %vm963_vm0 = vcmask (!%p302_p10), 261120   ;;  %s2411_s17 = sand.u32 (!%p302_p10), 1, %s2067_s25   ;;  %s2673_s21 = sshll.u32 (!%p302_p10), %s2075_s27, 10 }
  0x13   : > { %1256 = vmatprep.mubr.bf16.mxu1 (!%p302_p10), %v2087_v4  ;;  %1040 = vmatprep.mubr.f32.mxu0 (!%p302_p10), %v2089_v12  ;;  %v2254_v22 = vshrl.u32 (!%p302_p10), %v415_v19, 7  ;;  %s1647_s12 = scalar_lea.sflag (!%p302_p10), [#allocation9], %s2411_s17  ;;  %s2090_s16 = smov (!%p302_p10), [#allocation8]  }
  0x15   : > { %v2262_v23 = vsub.s32 (!%p302_p10), 0, %v2254_v22  ;;  %v421_v24 = vsub.s32 (!%p302_p10), 4, %v2254_v22  ;;  %v2266_v27 = vsub.s32 (!%p302_p10), 1, %v2254_v22  ;;  %v463_v28 = vsub.s32 (!%p302_p10), 5, %v2254_v22 }
  0x16   : > { %1947 = vset.pattern.permute.xlu0 (!%p302_p10), %v2088_v5  ;;  %754 = vperm.xlu1 (!%p302_p10), %1941, %v695_v3   ;;  %v2273_v32 = vsub.s32 (!%p302_p10), 2, %v2254_v22  ;;  %v513_v33 = vsub.s32 (!%p302_p10), 6, %v2254_v22  ;;  %v2280_v38 = vsub.s32 (!%p302_p10), 3, %v2254_v22  ;;  %v563_v39 = vsub.s32 (!%p302_p10), 7, %v2254_v22 }
  0x17   : > { %854 = vperm.xlu0 (!%p302_p10), %1947, %v695_v3  }
  0x18   : > { %s2251_s18 = scalar_select %p354_p11, %s2075_s27, 1 }
  0x1a   : > { %758 = vperm.xlu1 %1941, %v696_v6   ;;  %s1862_s19 = sshll.u32 %s2251_s18, 3  ;;  %s1828_s18 = sshll.u32 %s2411_s17, 6 }
  0x1b   : > { %862 = vperm.xlu0 %1947, %v697_v7   ;;  %s373_s22 = scalar_lea.vmem %s2666_s1, %s1862_s19  ;;  %s361_s8 = scalar_lea.vmem %s2665_s0, %s1862_s19 }
  0x1c   : > { %v693_v29 = vld [vmem:[%s373_s22] sm:$0xff]  ;;  %s2430_s23 = scalar_lea.vmem [#allocation8], %s1828_s18  ;;  %s1977_s19 = sshll.u32 %s2090_s16, 4  ;;  %s1978_s19 = int_to_ptr.vmem [resolvable:$false] %s1977_s19 }
  0x1d   : > { %v726_v30 = vrot.slane %v693_v29, %v2262_v23  ;;  %v730_v31 = vrot.slane %v693_v29, %v421_v24  ;;  %v768_v35 = vrot.slane %v693_v29, %v2266_v27  ;;  %v772_v36 = vrot.slane %v693_v29, %v463_v28  ;;  %s1680_s10 = sshll.u32 %s2430_s23, 4  ;;  %s1979_s20 = scalar_lea.vmem %s1978_s19, 2048  ;;  %s2576_s10 = int_to_ptr.vmem [resolvable:$true] %s1680_s10 }
  0x1e   : > { %1943 = vset.pattern.permute.xlu1 %v2085_v1  ;;  %v818_v42 = vrot.slane %v693_v29, %v2273_v32  ;;  %v822_v43 = vrot.slane %v693_v29, %v513_v33  ;;  %v868_v49 = vrot.slane %v693_v29, %v2280_v38  ;;  %v872_v50 = vrot.slane %v693_v29, %v563_v39  ;;  %s1973_s15 = scalar_lea.vmem %s2576_s10, 1024  ;;  %p1980_p1 = scmp.lt.s32.totalorder %s2576_s10, %s1978_s19 }
  0x1f   : > { %804 = vperm.xlu1 %1943, %v695_v3   ;;  %1950 = vset.pattern.permute.xlu0 %v2087_v4  ;;  %v736_v40 = vrot.slane %v726_v30, %v2262_v23  ;;  %v740_v41 = vrot.slane %v730_v31, %v2262_v23  ;;  %v778_v45 = vrot.slane %v768_v35, %v2266_v27  ;;  %p1974_p12 = scmp.ne.s32.totalorder %s2576_s10, %s1973_s15  ;;  %p1981_p2 = scmp.lt.s32.totalorder %s1979_s20, %s1973_s15 }
  0x20   : > { %704 = vperm.xlu0 %1950, %v2192_v0   ;;  %v782_v46 = vrot.slane %v772_v36, %v2266_v27  ;;  %v828_v54 = vrot.slane %v818_v42, %v2273_v32  ;;  %v832_v55 = vrot.slane %v822_v43, %v2273_v32  ;;  %v878_v61 = vrot.slane %v868_v49, %v2280_v38 }
  0x21   : > { %v882_v62 = vrot.slane %v872_v50, %v2280_v38  ;;  %p1975_p13 = pnand %p1974_p12, %p2174_p4  ;;  %p1982_p3 = por %p1981_p2, %p1980_p1 }
  0x23   : > { %1944 = vset.pattern.permute.xlu1 %v2087_v4  ;;  %p1976_p0 = pneg %p1975_p13 }
  0x24   : > { %709 = vperm.xlu0 %1950, %v695_v3   ;;  %719 = vperm.xlu1 %1944, %v697_v7  }
  0x25   : > { %p1983_p5 = pnand %p1982_p3, %p1976_p0 }
  0x28   : > { %714 = vperm.xlu0 %1950, %v696_v6   ;;  %1945 = vset.pattern.permute.xlu1 %v2085_v1 }
  0x29   : > { %808 = vperm.xlu1 %1945, %v696_v6  }
  0x2c   : > { %906 = vperm.xlu0 %1950, %v699_v8  }
  0x2d   : > { %1946 = vset.pattern.permute.xlu1 %v2088_v5 }
  0x2e   : > { %850 = vperm.xlu1 %1946, %v2192_v0  }
  0x30   : > { %396 = vperm.xlu0 %1950, %v2192_v0  }
  0x32   : > { %1948 = vset.pattern.permute.xlu1 %v2085_v1 }
  0x33   : > { %812 = vperm.xlu1 %1948, %v697_v7  }
  0x34   : > { %1952 = vset.pattern.permute.xlu0 %v2086_v2 }
  0x35   : > { %762 = vperm.xlu0 %1952, %v697_v7  }
  0x37   : > { %1949 = vset.pattern.permute.xlu1 %v2088_v5 }
  0x38   : > { %858 = vperm.xlu1 %1949, %v696_v6  }
  0x39   : > { %442 = vperm.xlu0 %1952, %v2192_v0  }
  0x3c   : > { %1951 = vset.pattern.permute.xlu1 %v2087_v4 }
  0x3d   : > { %901 = vperm.xlu1 %1951, %v698_v9   ;;  %450 = vperm.xlu0 %1952, %v696_v6  }
  0x41   : > { %911 = vperm.xlu1 %1951, %v700_v10   ;;  %1956 = vset.pattern.permute.xlu0 %v2085_v1 }
  0x42   : > { %496 = vperm.xlu0 %1956, %v695_v3  }
  0x45   : > { %916 = vperm.xlu1 %1951, %v701_v11  }
  0x46   : > { %500 = vperm.xlu0 %1956, %v696_v6  }
  0x49   : > { %401 = vperm.xlu1 %1951, %v695_v3  }
  0x4a   : > { %1960 = vset.pattern.permute.xlu0 %v2088_v5 }
  0x4b   : > { %546 = vperm.xlu0 %1960, %v695_v3  }
  0x4d   : > { %1953 = vset.pattern.permute.xlu1 %v2086_v2 }
  0x4e   : > { %446 = vperm.xlu1 %1953, %v695_v3  }
  0x4f   : > { %554 = vperm.xlu0 %1960, %v697_v7  }
  0x52   : > { %1954 = vset.pattern.permute.xlu1 %v2087_v4 }
  0x53   : > { %406 = vperm.xlu1 %1954, %v696_v6   ;;  %1964 = vset.pattern.permute.xlu0 %v2087_v4 }
  0x54   : > { %598 = vperm.xlu0 %1964, %v699_v8  }
  0x57   : > { %1955 = vset.pattern.permute.xlu1 %v2085_v1 }
  0x58   : > { %492 = vperm.xlu1 %1955, %v2192_v0  }
  0x5c   : > { %1957 = vset.pattern.permute.xlu1 %v2087_v4 }
  0x5d   : > { %411 = vperm.xlu1 %1957, %v697_v7  }
  0x61   : > { %1958 = vset.pattern.permute.xlu1 %v2086_v2 }
  0x62   : > { %454 = vperm.xlu1 %1958, %v697_v7  }
  0x66   : > { %1959 = vset.pattern.permute.xlu1 %v2088_v5 }
  0x67   : > { %542 = vperm.xlu1 %1959, %v2192_v0  }
  0x6b   : > { %1961 = vset.pattern.permute.xlu1 %v2085_v1 }
  0x6c   : > { %504 = vperm.xlu1 %1961, %v697_v7  }
  0x70   : > { %1962 = vset.pattern.permute.xlu1 %v2088_v5 }
  0x71   : > { %550 = vperm.xlu1 %1962, %v696_v6  }
  0x75   : > { %1963 = vset.pattern.permute.xlu1 %v2087_v4 }
  0x76   : > { %593 = vperm.xlu1 %1963, %v698_v9  }
  0x7a   : > { %603 = vperm.xlu1 %1963, %v700_v10  }
  0x7e   : > { %608 = vperm.xlu1 %1963, %v701_v11  }
  0x91   : > { %v751_v13 = vpop.permute.xlu1 %750  ;;  %v801_v14 = vpop.permute.xlu0 %800 }
  0x92   : > { %v783_v63 = vmul.f32 %v778_v45, %v751_v13  ;;  %v784_v0 = vmul.f32 %v782_v46, %v751_v13  ;;  %v833_v5 = vmul.f32 %v828_v54, %v801_v14  ;;  %v834_v6 = vmul.f32 %v832_v55, %v801_v14 }
  0x95   : > { %v755_v15 = vpop.permute.xlu1 %754 }
  0x96   : > { %v2243_v16 = vpop.permute.xlu0 %854  ;;  %v785_v52 = vmul.f32 %v778_v45, %v755_v15  ;;  %v786_v53 = vmul.f32 %v782_v46, %v755_v15 }
  0x97   : > { %v885_v15 = vmul.f32 %v878_v61, %v2243_v16  ;;  %v886_v19 = vmul.f32 %v882_v62, %v2243_v16 }
  0x99   : > { %v2246_v17 = vpop.permute.xlu1 %758 }
  0x9a   : > { %v2248_v18 = vpop.permute.xlu0 %862  ;;  %v787_v29 = vmul.f32 %v778_v45, %v2246_v17  ;;  %v788_v13 = vmul.f32 %v782_v46, %v2246_v17 }
  0x9e   : > { %v805_v20 = vpop.permute.xlu1 %804 }
  0x9f   : > { %v705_v21 = vpop.permute.xlu0 %704  ;;  %v835_v1 = vmul.f32 %v828_v54, %v805_v20  ;;  %v836_v2 = vmul.f32 %v832_v55, %v805_v20 }
  0xa0   : > { %v741_v57 = vmul.f32 %v736_v40, %v705_v21  ;;  %v742_v58 = vmul.f32 %v740_v41, %v705_v21 }
  0xa2   : > { %v791_v7 = vadd.f32 %v783_v63, %v741_v57  ;;  %v792_v8 = vadd.f32 %v784_v0, %v742_v58 }
  0xa3   : > { %v710_v25 = vpop.permute.xlu0 %709  ;;  %v720_v26 = vpop.permute.xlu1 %719 }
  0xa4   : > { %v743_v47 = vmul.f32 %v736_v40, %v710_v25  ;;  %v744_v48 = vmul.f32 %v740_v41, %v710_v25  ;;  %v747_v31 = vmul.f32 %v736_v40, %v720_v26  ;;  %v748_v35 = vmul.f32 %v740_v41, %v720_v26 }
  0xa5   : > { %v841_v49 = vadd.f32 %v833_v5, %v791_v7  ;;  %v842_v50 = vadd.f32 %v834_v6, %v792_v8 }
  0xa6   : > { %v793_v59 = vadd.f32 %v785_v52, %v743_v47  ;;  %v794_v60 = vadd.f32 %v786_v53, %v744_v48 }
  0xa7   : > { %v715_v34 = vpop.permute.xlu0 %714 }
  0xa8   : > { %v809_v37 = vpop.permute.xlu1 %808  ;;  %v843_v9 = vadd.f32 %v835_v1, %v793_v59  ;;  %v844_v10 = vadd.f32 %v836_v2, %v794_v60  ;;  %v745_v21 = vmul.f32 %v736_v40, %v715_v34  ;;  %v746_v25 = vmul.f32 %v740_v41, %v715_v34 }
  0xa9   : > { %v837_v34 = vmul.f32 %v828_v54, %v809_v37  ;;  %v838_v53 = vmul.f32 %v832_v55, %v809_v37 }
  0xaa   : > { %v893_v43 = vadd.f32 %v885_v15, %v843_v9  ;;  %v894_v47 = vadd.f32 %v886_v19, %v844_v10  ;;  %v795_v16 = vadd.f32 %v787_v29, %v745_v21  ;;  %v796_v52 = vadd.f32 %v788_v13, %v746_v25 }
  0xab   : > { %v907_v44 = vpop.permute.xlu0 %906 }
  0xac   : > { %v921_v26 = vadd.f32 %v907_v44, %v893_v43  ;;  %v922_v41 = vadd.f32 %v907_v44, %v894_v47  ;;  %v845_v63 = vadd.f32 %v837_v34, %v795_v16  ;;  %v846_v0 = vadd.f32 %v838_v53, %v796_v52 }
  0xad   : > { %v851_v51 = vpop.permute.xlu1 %850  ;;  %v889_v44 = vmul.f32 %v878_v61, %v2248_v18 }
  0xae   : > { %v883_v14 = vmul.f32 %v878_v61, %v851_v51  ;;  %v884_v36 = vmul.f32 %v882_v62, %v851_v51 }
  0xaf   : > { %v2295_v56 = vpop.permute.xlu0 %396 }
  0xb0   : > { %v892_v40 = vadd.f32 %v884_v36, %v842_v50 }
  0xb2   : > { %v813_v3 = vpop.permute.xlu1 %812 }
  0xb3   : > { %v839_v51 = vmul.f32 %v828_v54, %v813_v3  ;;  %v840_v59 = vmul.f32 %v832_v55, %v813_v3  ;;  %v890_v54 = vmul.f32 %v882_v62, %v2248_v18  ;;  %v2318_v55 = vmax.f32 %v921_v26, 0.0 }
  0xb4   : > { %v763_v11 = vpop.permute.xlu0 %762  ;;  %v2320_v3 = vmax.f32 %v922_v41, 0.0 }
  0xb5   : > { %v789_v30 = vmul.f32 %v778_v45, %v763_v11  ;;  %v790_v20 = vmul.f32 %v782_v46, %v763_v11  ;;  %v891_v46 = vadd.f32 %v883_v14, %v841_v49 }
  0xb6   : > { %v1068_v14 = vmul.f32 %v2320_v3, %v2320_v3 }
  0xb7   : > { %v859_v42 = vpop.permute.xlu1 %858  ;;  %v797_v57 = vadd.f32 %v789_v30, %v747_v31  ;;  %v798_v58 = vadd.f32 %v790_v20, %v748_v35  ;;  %v385_v20 = vld [vmem:[%s361_s8] sm:$0xff]  ;;  %v1067_v35 = vmul.f32 %v2318_v55, %v2318_v55  ;;  %s2573_s8 = scalar_lea.hbm %s2672_s7, %s2673_s21 }
  0xb8   : > { %v2303_v48 = vpop.permute.xlu0 %442  ;;  %v887_v17 = vmul.f32 %v878_v61, %v859_v42  ;;  %v888_v45 = vmul.f32 %v882_v62, %v859_v42  ;;  %v510_v42 = vrot.slane %v385_v20, %v2273_v32  ;;  %v514_v43 = vrot.slane %v385_v20, %v513_v33 }
  0xb9   : > { %v847_v6 = vadd.f32 %v839_v51, %v797_v57  ;;  %v848_v37 = vadd.f32 %v840_v59, %v798_v58  ;;  %v418_v34 = vrot.slane %v385_v20, %v2262_v23  ;;  %v422_v53 = vrot.slane %v385_v20, %v421_v24 }
  0xba   : > { %v895_v9 = vadd.f32 %v887_v17, %v845_v63  ;;  %v896_v10 = vadd.f32 %v888_v45, %v846_v0  ;;  %v460_v57 = vrot.slane %v385_v20, %v2266_v27  ;;  %v464_v33 = vrot.slane %v385_v20, %v463_v28 }
  0xbb   : > { %v897_v29 = vadd.f32 %v889_v44, %v847_v6  ;;  %v898_v13 = vadd.f32 %v890_v54, %v848_v37  ;;  %v2361_v26 = vrot.slane %v514_v43, %v2273_v32  ;;  %v560_v24 = vrot.slane %v385_v20, %v2280_v38  ;;  %v936_v43 = vld [vmem:[%s2669_s4 + $0x8] sm:$0xff] }
  0xbc   : > { %v902_v60 = vpop.permute.xlu1 %901  ;;  %v2305_v5 = vpop.permute.xlu0 %450  ;;  %v564_v51 = vrot.slane %v385_v20, %v563_v39  ;;  %v2371_v0 = vrot.slane %v418_v34, %v2262_v23  ;;  %v2378_v22 = vrot.slane %v422_v53, %v2262_v23  ;;  %v2381_v39 = vrot.slane %v460_v57, %v2266_v27 }
  0xbd   : > { %v919_v1 = vadd.f32 %v902_v60, %v891_v46  ;;  %v920_v2 = vadd.f32 %v902_v60, %v892_v40  ;;  %v2358_v40 = vrot.slane %v510_v42, %v2273_v32 }
  0xbe   : > { %v2390_v44 = vrot.slane %v564_v51, %v2280_v38 }
  0xbf   : > { %v2307_v7 = vmax.f32 %v919_v1, 0.0  ;;  %v2309_v8 = vmax.f32 %v920_v2, 0.0 }
  0xc0   : > { %v912_v11 = vpop.permute.xlu1 %911 }
  0xc1   : > { %v923_v15 = vadd.f32 %v912_v11, %v895_v9  ;;  %v924_v19 = vadd.f32 %v912_v11, %v896_v10  ;;  %v497_v21 = vpop.permute.xlu0 %496  ;;  %v1866_v25 = vpack.c.bf16 %v2320_v3, %v2309_v8  ;;  %v1868_v30 = vpack.c.bf16 %v2318_v55, %v2307_v7 }
  0xc2   : > { %v1065_v18 = vmul.f32 %v2307_v7, %v2307_v7  ;;  %v1066_v61 = vmul.f32 %v2309_v8, %v2309_v8  ;;  %v2384_v9 = vrot.slane %v464_v33, %v2266_v27  ;;  %v2387_v10 = vrot.slane %v560_v24, %v2280_v38  ;;  %v935_v27 = vld [vmem:[%s2669_s4] sm:$0xff] }
  0xc3   : > { %v2330_v62 = vmax.f32 %v923_v15, 0.0  ;;  %v2332_v31 = vmax.f32 %v924_v19, 0.0  ;;  %1867 = vmatprep.subr.bf16.mxu0 %v1866_v25  ;;  %v527_v23 = vmul.f32 %v2358_v40, %v497_v21  ;;  %v528_v15 = vmul.f32 %v2361_v26, %v497_v21 }
  0xc4   : > { %v917_v36 = vpop.permute.xlu1 %916  ;;  %1869 = vmatpush1.bf16.msra.mxu0 %v1868_v30  ;;  %v1073_v58 = vadd.f32 %v1067_v35, %v1065_v18  ;;  %v1082_v17 = vadd.f32 %v1068_v14, %v1066_v61 }
  0xc5   : > { %v1069_v47 = vmul.f32 %v2330_v62, %v2330_v62  ;;  %v1070_v49 = vmul.f32 %v2332_v31, %v2332_v31  ;;  %v925_v50 = vadd.f32 %v917_v36, %v897_v29  ;;  %v926_v16 = vadd.f32 %v917_v36, %v898_v13  ;;  %v2345_v52 = vpop.permute.xlu0 %500 }
  0xc7   : > { %v2353_v45 = vmax.f32 %v925_v50, 0.0  ;;  %v2355_v46 = vmax.f32 %v926_v16, 0.0  ;;  %v1074_v59 = vadd.f32 %v1073_v58, %v1069_v47  ;;  %v1083_v28 = vadd.f32 %v1082_v17, %v1070_v49 }
  0xc8   : > { %v402_v41 = vpop.permute.xlu1 %401 }
  0xc9   : > { %v1071_v60 = vmul.f32 %v2353_v45, %v2353_v45  ;;  %v1072_v63 = vmul.f32 %v2355_v46, %v2355_v46  ;;  %v1870_v32 = vpack.c.bf16 %v2355_v46, %v2332_v31  ;;  %v1872_v1 = vpack.c.bf16 %v2353_v45, %v2330_v62 }
  0xca   : > { %v547_v2 = vpop.permute.xlu0 %546  ;;  %v435_v25 = vmul.f32 %v2371_v0, %v402_v41  ;;  %v436_v29 = vmul.f32 %v2378_v22, %v402_v41  ;;  %v937_v41 = vld [vmem:[%s2669_s4 + $0x10] sm:$0xff] }
  0xcb   : > { %v1075_v6 = vadd.f32 %v1074_v59, %v1071_v60  ;;  %v1084_v37 = vadd.f32 %v1083_v28, %v1072_v63  ;;  %1871 = vmatprep.subr.bf16.mxu0 %v1870_v32  ;;  %v577_v35 = vmul.f32 %v2387_v10, %v547_v2  ;;  %v578_v14 = vmul.f32 %v2390_v44, %v547_v2 }
  0xcc   : > { %1873 = vmatpush1.bf16.msra.mxu0 %v1872_v1 }
  0xcd   : > { %v1076_v54 = vrot.slane %v1075_v6, 4  ;;  %v1085_v11 = vrot.slane %v1084_v37, 4  ;;  %v447_v19 = vpop.permute.xlu1 %446 }
  0xce   : > { %v477_v38 = vmul.f32 %v2381_v39, %v447_v19  ;;  %v478_v13 = vmul.f32 %v2384_v9, %v447_v19  ;;  %v2401_v30 = vpop.permute.xlu0 %554 }
  0xcf   : > { %v1077_v20 = vadd.f32 %v1076_v54, %v1075_v6  ;;  %v1086_v18 = vadd.f32 %v1085_v11, %v1084_v37  ;;  %1834 = vmatmul.mubr.msk.f32.vlgmr.msra.gmra.mrb[0].mxu0 %vm963_vm0, %v935_v27  ;;  %v938_v6 = vld [vmem:[%s2669_s4 + $0x18] sm:$0xff] }
  0xd0   : > { %v485_v21 = vadd.f32 %v477_v38, %v435_v25  ;;  %v486_v61 = vadd.f32 %v478_v13, %v436_v29  ;;  %1046 = vmatprep.mubr.f32.mxu0 %v2089_v12 }
  0xd1   : > { %v1078_v36 = vrot.slane %v1077_v20, 2  ;;  %v1087_v42 = vrot.slane %v1086_v18, 2 }
  0xd2   : > { %v407_v47 = vpop.permute.xlu1 %406  ;;  %v535_v49 = vadd.f32 %v527_v23, %v485_v21  ;;  %v536_v50 = vadd.f32 %v528_v15, %v486_v61 }
  0xd3   : > { %v1079_v16 = vadd.f32 %v1078_v36, %v1077_v20  ;;  %v1088_v34 = vadd.f32 %v1087_v42, %v1086_v18  ;;  %v599_v53 = vpop.permute.xlu0 %598  ;;  %1835 = vmatmul.mubr.msk.f32.gmra.mrb[2].mxu0 %vm963_vm0, %v936_v43  ;;  %v438_v61 = vmul.f32 %v2378_v22, %v407_v47 }
  0xd4   : > { %v585_v57 = vadd.f32 %v577_v35, %v535_v49  ;;  %v586_v33 = vadd.f32 %v578_v14, %v536_v50  ;;  %1052 = vmatprep.mubr.f32.mxu0 %v2089_v12  ;;  %v479_v50 = vmul.f32 %v2381_v39, %v2305_v5 }
  0xd5   : > { %v1080_v58 = vrot.slane %v1079_v16, 1  ;;  %v1089_v17 = vrot.slane %v1088_v34, 1 }
  0xd6   : > { %v613_v24 = vadd.f32 %v599_v53, %v585_v57  ;;  %v614_v51 = vadd.f32 %v599_v53, %v586_v33 }
  0xd7   : > { %v1081_v59 = vadd.f32 %v1080_v58, %v1079_v16  ;;  %v1090_v28 = vadd.f32 %v1089_v17, %v1088_v34  ;;  %v493_v32 = vpop.permute.xlu1 %492  ;;  %1836 = vmatmul.mubr.msk.f32.gmra.mrb[4].mxu0 %vm963_vm0, %v937_v41  ;;  %v529_v16 = vmul.f32 %v2358_v40, %v2345_v52 }
  0xd8   : > { %v2419_v60 = vmax.f32 %v613_v24, 0.0  ;;  %v2421_v63 = vmax.f32 %v614_v51, 0.0  ;;  %1058 = vmatprep.mubr.f32.mxu0 %v2089_v12  ;;  %v526_v35 = vmul.f32 %v2361_v26, %v493_v32 }
  0xd9   : > { %v1091_v1 = vadd.f32 1e-12, %v1081_v59  ;;  %v1092_v2 = vadd.f32 1e-12, %v1090_v28  ;;  %v581_v28 = vmul.f32 %v2387_v10, %v2401_v30 }
  0xda   : > { %629 = vst [vmem:[%s2430_s23 + $0x10] sm:$0xff] %v2419_v60  ;;  %630 = vst [vmem:[%s2430_s23 + $0x18] sm:$0xff] %v2421_v63 }
  0xdb   : > { %1965 = vrsqrt.f32 %v1091_v1  ;;  %1837 = vmatmul.mubr.msk.f32.gmra.mrb[6].mxu0 %vm963_vm0, %v938_v6 }
  0xdc   : > { %1967 = vrsqrt.f32 %v1092_v2  ;;  %v412_v37 = vpop.permute.xlu1 %411 }
  0xdd   : > { %v439_v14 = vmul.f32 %v2371_v0, %v412_v37 }
  0xe1   : > { %v455_v54 = vpop.permute.xlu1 %454 }
  0xe2   : > { %v481_v36 = vmul.f32 %v2381_v39, %v455_v54  ;;  %v482_v42 = vmul.f32 %v2384_v9, %v455_v54 }
  0xe5   : > { %v1966_v12 = vpop.eup %1965 }
  0xe6   : > { %v1968_v11 = vpop.eup %1967  ;;  %v1095_v23 = vmul.f32 %v1966_v12, %v2307_v7  ;;  %v1097_v15 = vmul.f32 %v1966_v12, %v2318_v55  ;;  %v543_v19 = vpop.permute.xlu1 %542  ;;  %v1101_v25 = vmul.f32 %v1966_v12, %v2353_v45  ;;  %v1099_v13 = vmul.f32 %v1966_v12, %v2330_v62 }
  0xe7   : > { %v1096_v27 = vmul.f32 %v1968_v11, %v2309_v8  ;;  %v1098_v29 = vmul.f32 %v1968_v11, %v2320_v3  ;;  %v1102_v20 = vmul.f32 %v1968_v11, %v2355_v46  ;;  %v1100_v21 = vmul.f32 %v1968_v11, %v2332_v31 }
  0xe8   : > { %v1103_v38 = vpack.c.bf16 %v1097_v15, %v1095_v23  ;;  %v475_v7 = vmul.f32 %v2381_v39, %v2303_v48  ;;  %v476_v55 = vmul.f32 %v2384_v9, %v2303_v48  ;;  %v433_v45 = vmul.f32 %v2371_v0, %v2295_v56 }
  0xe9   : > { %v1104_v18 = vpack.c.bf16 %v1098_v29, %v1096_v27  ;;  %v434_v3 = vmul.f32 %v2378_v22, %v2295_v56  ;;  %v437_v62 = vmul.f32 %v2371_v0, %v407_v47  ;;  %v1105_v46 = vpack.c.bf16 %v1101_v25, %v1099_v13 }
  0xea   : > { %1143 = vxpose.xlu0.c.b16.start [1/2] (short) %v1103_v38, 128  ;;  %v525_v31 = vmul.f32 %v2358_v40, %v493_v32  ;;  %v440_v48 = vmul.f32 %v2378_v22, %v412_v37  ;;  %v1106_v43 = vpack.c.bf16 %v1102_v20, %v1100_v21  ;;  %v483_v56 = vadd.f32 %v475_v7, %v433_v45 }
  0xeb   : > { %v505_v8 = vpop.permute.xlu1 %504  ;;  %1159 = vxpose.xlu1.c.b16.start [1/2] (short) %v1104_v18, 128  ;;  %v484_v49 = vadd.f32 %v476_v55, %v434_v3  ;;  %v480_v47 = vmul.f32 %v2384_v9, %v2305_v5  ;;  %v530_v0 = vmul.f32 %v2361_v26, %v2345_v52  ;;  %v575_v22 = vmul.f32 %v2387_v10, %v543_v19 }
  0xec   : > { %v576_v34 = vmul.f32 %v2390_v44, %v543_v19  ;;  %v487_v57 = vadd.f32 %v479_v50, %v437_v62  ;;  %v533_v58 = vadd.f32 %v525_v31, %v483_v56  ;;  %v489_v39 = vadd.f32 %v481_v36, %v439_v14 }
  0xed   : > { %v488_v33 = vadd.f32 %v480_v47, %v438_v61  ;;  %v534_v17 = vadd.f32 %v526_v35, %v484_v49  ;;  %v490_v41 = vadd.f32 %v482_v42, %v440_v48  ;;  %v531_v5 = vmul.f32 %v2358_v40, %v505_v8  ;;  %v940_v47 = vld [vmem:[%s2670_s5 + $0x8] sm:$0xff] }
  0xee   : > { %1144 = vxpose.xlu0.c.b16.end [2/2] (short) %v1105_v46, 128  ;;  %v532_v9 = vmul.f32 %v2361_v26, %v505_v8  ;;  %v583_v51 = vadd.f32 %v575_v22, %v533_v58  ;;  %v582_v32 = vmul.f32 %v2390_v44, %v2401_v30  ;;  %v537_v2 = vadd.f32 %v529_v16, %v487_v57  ;;  %v942_v57 = vld [vmem:[%s2670_s5 + $0x18] sm:$0xff] }
  0xef   : > { %1160 = vxpose.xlu1.c.b16.end [2/2] (short) %v1106_v43, 128  ;;  %v584_v59 = vadd.f32 %v576_v34, %v534_v17  ;;  %v538_v6 = vadd.f32 %v530_v0, %v488_v33  ;;  %v539_v40 = vadd.f32 %v531_v5, %v489_v39  ;;  %v637_v20 = vmul.f32 %v2419_v60, %v2419_v60 }
  0xf0   : > { %v551_v53 = vpop.permute.xlu1 %550  ;;  %v540_v37 = vadd.f32 %v532_v9, %v490_v41  ;;  %v638_v18 = vmul.f32 %v2421_v63, %v2421_v63  ;;  %v941_v41 = vld [vmem:[%s2670_s5 + $0x10] sm:$0xff] }
  0xf1   : > { %v579_v24 = vmul.f32 %v2387_v10, %v551_v53  ;;  %v580_v52 = vmul.f32 %v2390_v44, %v551_v53  ;;  %v589_v30 = vadd.f32 %v581_v28, %v539_v40  ;;  %v939_v53 = vld [vmem:[%s2670_s5] sm:$0xff] }
  0xf2   : > { %v590_v27 = vadd.f32 %v582_v32, %v540_v37 }
  0xf3   : > { %v587_v23 = vadd.f32 %v579_v24, %v537_v2  ;;  %v588_v15 = vadd.f32 %v580_v52, %v538_v6 }
  0xf5   : > { %v594_v1 = vpop.permute.xlu1 %593 }
  0xf6   : > { %v611_v26 = vadd.f32 %v594_v1, %v583_v51  ;;  %v612_v54 = vadd.f32 %v594_v1, %v584_v59 }
  0xf8   : > { %v619_v12 = vmax.f32 %v611_v26, 0.0  ;;  %v2479_v11 = vmax.f32 %v612_v54, 0.0 }
  0xf9   : > { %v604_v19 = vpop.permute.xlu1 %603 }
  0xfa   : > { %627 = vst [vmem:[%s2430_s23] sm:$0xff] %v619_v12  ;;  %628 = vst [vmem:[%s2430_s23 + $0x8] sm:$0xff] %v2479_v11  ;;  %v615_v10 = vadd.f32 %v604_v19, %v587_v23  ;;  %v616_v44 = vadd.f32 %v604_v19, %v588_v15  ;;  %v635_v25 = vmul.f32 %v619_v12, %v619_v12 }
  0xfb   : > { %v636_v29 = vmul.f32 %v2479_v11, %v2479_v11 }
  0xfc   : > { %v623_v38 = vmax.f32 %v615_v10, 0.0  ;;  %v624_v13 = vmax.f32 %v616_v44, 0.0  ;;  %v643_v3 = vadd.f32 %v637_v20, %v635_v25 }
  0xfd   : > { %v609_v21 = vpop.permute.xlu1 %608  ;;  %v652_v62 = vadd.f32 %v638_v18, %v636_v29 }
  0xfe   : > { %631 = vst [vmem:[%s2430_s23 + $0x20] sm:$0xff] %v623_v38  ;;  %632 = vst [vmem:[%s2430_s23 + $0x28] sm:$0xff] %v624_v13  ;;  %v639_v7 = vmul.f32 %v623_v38, %v623_v38  ;;  %v640_v55 = vmul.f32 %v624_v13, %v624_v13  ;;  %v617_v8 = vadd.f32 %v609_v21, %v589_v30 }
  0xff   : > { %v618_v45 = vadd.f32 %v609_v21, %v590_v27 }
 0x100   : > { %v625_v46 = vmax.f32 %v617_v8, 0.0  ;;  %v644_v31 = vadd.f32 %v643_v3, %v639_v7  ;;  %v653_v35 = vadd.f32 %v652_v62, %v640_v55 }
 0x101   : > { %v626_v61 = vmax.f32 %v618_v45, 0.0 }
 0x102   : > { %633 = vst [vmem:[%s2430_s23 + $0x30] sm:$0xff] %v625_v46  ;;  %v641_v14 = vmul.f32 %v625_v46, %v625_v46 }
 0x103   : > { %634 = vst [vmem:[%s2430_s23 + $0x38] sm:$0xff] %v626_v61  ;;  %v642_v48 = vmul.f32 %v626_v61, %v626_v61 }
 0x104   : > { %v645_v36 = vadd.f32 %v644_v31, %v641_v14 }
 0x105   : > { %v654_v42 = vadd.f32 %v653_v35, %v642_v48 }
 0x106   : > { %v646_v43 = vrot.slane %v645_v36, 4 }
 0x107   : > { %v655_v56 = vrot.slane %v654_v42, 4 }
 0x108   : > { %v647_v49 = vadd.f32 %v646_v43, %v645_v36 }
 0x109   : > { %v656_v50 = vadd.f32 %v655_v56, %v654_v42 }
 0x10a   : > { %v648_v16 = vrot.slane %v647_v49, 2 }
 0x10b   : > { %v657_v0 = vrot.slane %v656_v50, 2  ;;  %950 = vperm.xlu1 %1963, %v940_v47  }
 0x10c   : > { %v649_v22 = vadd.f32 %v648_v16, %v647_v49 }
 0x10d   : > { %v658_v34 = vadd.f32 %v657_v0, %v656_v50 }
 0x10e   : > { %v650_v33 = vrot.slane %v649_v22, 1 }
 0x10f   : > { %v659_v58 = vrot.slane %v658_v34, 1  ;;  %945 = vperm.xlu0 %1964, %v939_v53   ;;  %960 = vperm.xlu1 %1963, %v942_v57  }
 0x110   : > { %v651_v17 = vadd.f32 %v650_v33, %v649_v22 }
 0x111   : > { %v660_v39 = vadd.f32 %v659_v58, %v658_v34 }
 0x112   : > { %v661_v5 = vadd.f32 1e-12, %v651_v17 }
 0x113   : > { %v662_v9 = vadd.f32 1e-12, %v660_v39  ;;  %955 = vperm.xlu0 %1964, %v941_v41  }
 0x114   : > { %1969 = vrsqrt.f32 %v661_v5 }
 0x115   : > { %1971 = vrsqrt.f32 %v662_v9 }
 0x11e   : > { %v1970_v24 = vpop.eup %1969 }
 0x11f   : > { %v1972_v52 = vpop.eup %1971  ;;  %v665_v51 = vmul.f32 %v1970_v24, %v619_v12  ;;  %v667_v59 = vmul.f32 %v1970_v24, %v2419_v60  ;;  %v669_v37 = vmul.f32 %v1970_v24, %v623_v38  ;;  %v671_v26 = vmul.f32 %v1970_v24, %v625_v46 }
 0x120   : > { %v666_v28 = vmul.f32 %v1972_v52, %v2479_v11  ;;  %v668_v32 = vmul.f32 %v1972_v52, %v2421_v63  ;;  %v670_v1 = vmul.f32 %v1972_v52, %v624_v13  ;;  %v672_v2 = vmul.f32 %v1972_v52, %v626_v61 }
 0x121   : > { %v673_v6 = vpack.c.bf16 %v667_v59, %v665_v51  ;;  %v675_v23 = vpack.c.bf16 %v671_v26, %v669_v37 }
 0x122   : > { %v674_v40 = vpack.c.bf16 %v668_v32, %v666_v28  ;;  %v676_v54 = vpack.c.bf16 %v672_v2, %v670_v1 }
 0x124   : > { %1224 = vmatprep.subr.bf16.mxu1 %v674_v40 }
 0x125   : > { %1225 = vmatpush1.bf16.msra.mxu1 %v673_v6 }
 0x126   : > { %1226 = vmatprep.subr.bf16.mxu1 %v676_v54 }
 0x129   : > { %1227 = vmatpush1.bf16.msra.mxu1 %v675_v23 }
 0x150   : > { %v1151_v15 = vpop.trf.xlu0 }
 0x151   : > { %1838 = vmatmul.mubr.msk.bf16.vlgmr.msra.gmra.mrb[0].mxu1 %vm963_vm0, %v1151_v15  ;;  %v1167_v10 = vpop.trf.xlu1 }
 0x152   : > { %1266 = vmatprep.mubr.bf16.mxu1 %v2087_v4 }
 0x154   : > { %v1152_v60 = vpop.trf.xlu0 }
 0x155   : > { %v1168_v44 = vpop.trf.xlu1 }
 0x158   : > { %v1153_v63 = vpop.trf.xlu0 }
 0x159   : > { %1839 = vmatmul.mubr.msk.bf16.gmra.mrb[4].mxu1 %vm963_vm0, %v1152_v60  ;;  %v1169_v27 = vpop.trf.xlu1 }
 0x15a   : > { %1276 = vmatprep.mubr.bf16.mxu1 %v2087_v4 }
 0x15c   : > { %v1154_v12 = vpop.trf.xlu0 }
 0x15d   : > { %v1170_v29 = vpop.trf.xlu1 }
 0x160   : > { %v1155_v11 = vpop.trf.xlu0 }
 0x161   : > { %1840 = vmatmul.mubr.msk.bf16.gmra.mrb[8].mxu1 %vm963_vm0, %v1153_v63  ;;  %v1171_v38 = vpop.trf.xlu1 }
 0x162   : > { %1286 = vmatprep.mubr.bf16.mxu1 %v2087_v4 }
 0x164   : > { %v1156_v19 = vpop.trf.xlu0 }
 0x165   : > { %v1172_v13 = vpop.trf.xlu1 }
 0x168   : > { %v1157_v30 = vpop.trf.xlu0 }
 0x169   : > { %1841 = vmatmul.mubr.msk.bf16.gmra.mrb[12].mxu1 %vm963_vm0, %v1154_v12  ;;  %v1173_v20 = vpop.trf.xlu1 }
 0x16a   : > { %1296 = vmatprep.mubr.bf16.mxu1 %v2087_v4 }
 0x16c   : > { %v1158_v25 = vpop.trf.xlu0 }
 0x16d   : > { %v1174_v18 = vpop.trf.xlu1 }
 0x171   : > { %1842 = vmatmul.mubr.msk.bf16.gmra.mrb[16].mxu1 %vm963_vm0, %v1155_v11 }
 0x172   : > { %1306 = vmatprep.mubr.bf16.mxu1 %v2087_v4 }
 0x179   : > { %1843 = vmatmul.mubr.msk.bf16.gmra.mrb[20].mxu1 %vm963_vm0, %v1156_v19 }
 0x17a   : > { %1316 = vmatprep.mubr.bf16.mxu1 %v2087_v4 }
 0x181   : > { %1844 = vmatmul.mubr.msk.bf16.gmra.mrb[24].mxu1 %vm963_vm0, %v1157_v30 }
 0x182   : > { %1326 = vmatprep.mubr.bf16.mxu1 %v2087_v4 }
 0x189   : > { %1845 = vmatmul.mubr.msk.bf16.gmra.mrb[28].mxu1 %vm963_vm0, %v1158_v25 }
 0x18a   : > { %1336 = vmatprep.mubr.bf16.mxu1 %v2087_v4  ;;  %v951_v45 = vpop.permute.xlu1 %950 }
 0x18e   : > { %v946_v21 = vpop.permute.xlu0 %945  ;;  %v961_v42 = vpop.permute.xlu1 %960 }
 0x191   : > { %1846 = vmatmul.mubr.msk.bf16.gmra.mrb[32].mxu1 %vm963_vm0, %v1167_v10 }
 0x192   : > { %1346 = vmatprep.mubr.bf16.mxu1 %v2087_v4  ;;  %v956_v43 = vpop.permute.xlu0 %955 }
 0x199   : > { %1847 = vmatmul.mubr.msk.bf16.gmra.mrb[36].mxu1 %vm963_vm0, %v1168_v44 }
 0x19a   : > { %1356 = vmatprep.mubr.bf16.mxu1 %v2087_v4 }
 0x1a1   : > { %1848 = vmatmul.mubr.msk.bf16.gmra.mrb[40].mxu1 %vm963_vm0, %v1169_v27 }
 0x1a2   : > { %1366 = vmatprep.mubr.bf16.mxu1 %v2087_v4  ;;  %v1042_v7 = vpop.f32.mrb[0].mxu0 }
 0x1a3   : > { %v2531_v55 = vadd.f32 %v1042_v7, %v946_v21  ;;  %v1044_v8 = vpop.f32.mrb[1].mxu0 }
 0x1a4   : > { %v1045_v61 = vadd.f32 %v1044_v8, %v946_v21 }
 0x1a6   : > { %v1048_v3 = vpop.f32.mrb[2].mxu0 }
 0x1a7   : > { %v2533_v62 = vadd.f32 %v1048_v3, %v951_v45  ;;  %v1050_v46 = vpop.f32.mrb[3].mxu0 }
 0x1a8   : > { %v1051_v31 = vadd.f32 %v1050_v46, %v951_v45 }
 0x1a9   : > { %1849 = vmatmul.mubr.msk.bf16.gmra.mrb[44].mxu1 %vm963_vm0, %v1170_v29  ;;  %v1115_v35 = vpack.c.bf16 %v2533_v62, %v2531_v55 }
 0x1aa   : > { %1376 = vmatprep.mubr.bf16.mxu1 %v2087_v4  ;;  %v1116_v14 = vpack.c.bf16 %v1051_v31, %v1045_v61  ;;  %v1054_v48 = vpop.f32.mrb[4].mxu0 }
 0x1ab   : > { %v1056_v36 = vpop.f32.mrb[5].mxu0  ;;  %v2539_v49 = vadd.f32 %v1054_v48, %v956_v43 }
 0x1ac   : > { %1585 = vmatprep.mubr.bf16.mxu0 %v1116_v14  ;;  %v2543_v16 = vadd.f32 %v1056_v36, %v956_v43 }
 0x1ae   : > { %v1060_v56 = vpop.f32.mrb[6].mxu0 }
 0x1af   : > { %v2541_v50 = vadd.f32 %v1060_v56, %v961_v42  ;;  %v1062_v47 = vpop.f32.mrb[7].mxu0 }
 0x1b0   : > { %v2545_v0 = vadd.f32 %v1062_v47, %v961_v42 }
 0x1b1   : > { %1850 = vmatmul.mubr.msk.bf16.gmra.mrb[48].mxu1 %vm963_vm0, %v1171_v38  ;;  %v1117_v22 = vpack.c.bf16 %v2541_v50, %v2539_v49 }
 0x1b2   : > { %1386 = vmatprep.mubr.bf16.mxu1 %v2087_v4  ;;  %v1118_v34 = vpack.c.bf16 %v2545_v0, %v2543_v16 }
 0x1b9   : > { %1851 = vmatmul.mubr.msk.bf16.gmra.mrb[52].mxu1 %vm963_vm0, %v1172_v13 }
 0x1ba   : > { %1396 = vmatprep.mubr.bf16.mxu1 %v2087_v4 }
 0x1c1   : > { %1852 = vmatmul.mubr.msk.bf16.gmra.mrb[56].mxu1 %vm963_vm0, %v1173_v20 }
 0x1c2   : > { %1406 = vmatprep.mubr.bf16.mxu1 %v2087_v4 }
 0x1c9   : > { %1853 = vmatmul.mubr.msk.bf16.gmra.mrb[60].mxu1 %vm963_vm0, %v1174_v18 }
 0x224   : > { %v1258_v53 = vpop.f32.mrb[0].mxu1 }
 0x225   : > { %v1260_v57 = vpop.f32.mrb[1].mxu1  ;;  %v1417_v58 = vmax.f32 %v1258_v53, 0.0 }
 0x226   : > { %v1262_v33 = vpop.f32.mrb[2].mxu1  ;;  %v1418_v41 = vmax.f32 %v1260_v57, 0.0 }
 0x227   : > { %v1419_v17 = vmax.f32 %v1262_v33, 0.0  ;;  %v1264_v39 = vpop.f32.mrb[3].mxu1 }
 0x228   : > { %v1420_v5 = vmax.f32 %v1264_v39, 0.0 }
 0x229   : > { %v1481_v9 = vpack.c.bf16 %v1419_v17, %v1417_v58 }
 0x22a   : > { %v1482_v24 = vpack.c.bf16 %v1420_v5, %v1418_v41 }
 0x22b   : > { %v1513_v59 = vmul.bf16 %v1481_v9, %v1481_v9 }
 0x22c   : > { %v1514_v52 = vmul.bf16 %v1482_v24, %v1482_v24  ;;  %v1268_v51 = vpop.f32.mrb[4].mxu1 }
 0x22d   : > { %v1270_v28 = vpop.f32.mrb[5].mxu1  ;;  %v1421_v1 = vmax.f32 %v1268_v51, 0.0 }
 0x22e   : > { %v1272_v32 = vpop.f32.mrb[6].mxu1  ;;  %1553 = vmatprep.subr.bf16.mxu0 %v1514_v52  ;;  %v1422_v6 = vmax.f32 %v1270_v28, 0.0 }
 0x22f   : > { %v1423_v4 = vmax.f32 %v1272_v32, 0.0  ;;  %v1274_v2 = vpop.f32.mrb[7].mxu1  ;;  %1554 = vmatpush1.bf16.msra.mxu0 %v1513_v59 }
 0x230   : > { %v1424_v40 = vmax.f32 %v1274_v2, 0.0 }
 0x231   : > { %v1483_v37 = vpack.c.bf16 %v1423_v4, %v1421_v1 }
 0x232   : > { %v1484_v26 = vpack.c.bf16 %v1424_v40, %v1422_v6 }
 0x233   : > { %v1515_v15 = vmul.bf16 %v1483_v37, %v1483_v37 }
 0x234   : > { %v1516_v54 = vmul.bf16 %v1484_v26, %v1484_v26  ;;  %v1278_v23 = vpop.f32.mrb[8].mxu1 }
 0x235   : > { %v1280_v60 = vpop.f32.mrb[9].mxu1  ;;  %v1425_v12 = vmax.f32 %v1278_v23, 0.0 }
 0x236   : > { %v1282_v63 = vpop.f32.mrb[10].mxu1  ;;  %1555 = vmatprep.subr.bf16.mxu0 %v1516_v54  ;;  %v1426_v10 = vmax.f32 %v1280_v60, 0.0 }
 0x237   : > { %v1427_v11 = vmax.f32 %v1282_v63, 0.0  ;;  %v1284_v19 = vpop.f32.mrb[11].mxu1  ;;  %1556 = vmatpush1.bf16.msra.mxu0 %v1515_v15 }
 0x238   : > { %v1428_v44 = vmax.f32 %v1284_v19, 0.0 }
 0x239   : > { %v1485_v30 = vpack.c.bf16 %v1427_v11, %v1425_v12 }
 0x23a   : > { %v1486_v27 = vpack.c.bf16 %v1428_v44, %v1426_v10 }
 0x23b   : > { %v1517_v38 = vmul.bf16 %v1485_v30, %v1485_v30 }
 0x23c   : > { %v1518_v25 = vmul.bf16 %v1486_v27, %v1486_v27  ;;  %v1288_v29 = vpop.f32.mrb[12].mxu1 }
 0x23d   : > { %v1290_v13 = vpop.f32.mrb[13].mxu1  ;;  %v1429_v18 = vmax.f32 %v1288_v29, 0.0 }
 0x23e   : > { %v1292_v20 = vpop.f32.mrb[14].mxu1  ;;  %1557 = vmatprep.subr.bf16.mxu0 %v1518_v25  ;;  %v1430_v8 = vmax.f32 %v1290_v13, 0.0 }
 0x23f   : > { %v1431_v21 = vmax.f32 %v1292_v20, 0.0  ;;  %v1294_v7 = vpop.f32.mrb[15].mxu1  ;;  %1558 = vmatpush1.bf16.msra.mxu0 %v1517_v38 }
 0x240   : > { %v1432_v45 = vmax.f32 %v1294_v7, 0.0 }
 0x241   : > { %v1487_v3 = vpack.c.bf16 %v1431_v21, %v1429_v18 }
 0x242   : > { %v1488_v46 = vpack.c.bf16 %v1432_v45, %v1430_v8 }
 0x243   : > { %v1519_v14 = vmul.bf16 %v1487_v3, %v1487_v3 }
 0x244   : > { %v1520_v61 = vmul.bf16 %v1488_v46, %v1488_v46  ;;  %v1298_v31 = vpop.f32.mrb[16].mxu1 }
 0x245   : > { %v1300_v48 = vpop.f32.mrb[17].mxu1  ;;  %v1433_v42 = vmax.f32 %v1298_v31, 0.0 }
 0x246   : > { %v1302_v36 = vpop.f32.mrb[18].mxu1  ;;  %1559 = vmatprep.subr.bf16.mxu0 %v1520_v61  ;;  %v1434_v47 = vmax.f32 %v1300_v48, 0.0 }
 0x247   : > { %v1435_v43 = vmax.f32 %v1302_v36, 0.0  ;;  %v1304_v56 = vpop.f32.mrb[19].mxu1  ;;  %1560 = vmatpush1.bf16.msra.mxu0 %v1519_v14 }
 0x248   : > { %v1436_v53 = vmax.f32 %v1304_v56, 0.0 }
 0x249   : > { %v1489_v57 = vpack.c.bf16 %v1435_v43, %v1433_v42 }
 0x24a   : > { %v1490_v33 = vpack.c.bf16 %v1436_v53, %v1434_v47 }
 0x24b   : > { %v1521_v39 = vmul.bf16 %v1489_v57, %v1489_v57 }
 0x24c   : > { %v1522_v58 = vmul.bf16 %v1490_v33, %v1490_v33  ;;  %v1308_v17 = vpop.f32.mrb[20].mxu1 }
 0x24d   : > { %v1310_v41 = vpop.f32.mrb[21].mxu1  ;;  %v1437_v9 = vmax.f32 %v1308_v17, 0.0 }
 0x24e   : > { %v1312_v5 = vpop.f32.mrb[22].mxu1  ;;  %1561 = vmatprep.subr.bf16.mxu0 %v1522_v58  ;;  %v1438_v51 = vmax.f32 %v1310_v41, 0.0 }
 0x24f   : > { %v1439_v24 = vmax.f32 %v1312_v5, 0.0  ;;  %v1314_v52 = vpop.f32.mrb[23].mxu1  ;;  %1562 = vmatpush1.bf16.msra.mxu0 %v1521_v39 }
 0x250   : > { %v1440_v59 = vmax.f32 %v1314_v52, 0.0 }
 0x251   : > { %v1491_v28 = vpack.c.bf16 %v1439_v24, %v1437_v9 }
 0x252   : > { %v1492_v32 = vpack.c.bf16 %v1440_v59, %v1438_v51 }
 0x253   : > { %v1523_v2 = vmul.bf16 %v1491_v28, %v1491_v28 }
 0x254   : > { %v1524_v1 = vmul.bf16 %v1492_v32, %v1492_v32  ;;  %v1318_v4 = vpop.f32.mrb[24].mxu1 }
 0x255   : > { %v1320_v6 = vpop.f32.mrb[25].mxu1  ;;  %v1441_v37 = vmax.f32 %v1318_v4, 0.0 }
 0x256   : > { %v1322_v40 = vpop.f32.mrb[26].mxu1  ;;  %1563 = vmatprep.subr.bf16.mxu0 %v1524_v1  ;;  %v1442_v23 = vmax.f32 %v1320_v6, 0.0 }
 0x257   : > { %v1443_v26 = vmax.f32 %v1322_v40, 0.0  ;;  %v1324_v54 = vpop.f32.mrb[27].mxu1  ;;  %1564 = vmatpush1.bf16.msra.mxu0 %v1523_v2 }
 0x258   : > { %v1444_v15 = vmax.f32 %v1324_v54, 0.0 }
 0x259   : > { %v1493_v60 = vpack.c.bf16 %v1443_v26, %v1441_v37 }
 0x25a   : > { %v1494_v63 = vpack.c.bf16 %v1444_v15, %v1442_v23 }
 0x25b   : > { %v1525_v19 = vmul.bf16 %v1493_v60, %v1493_v60 }
 0x25c   : > { %v1526_v12 = vmul.bf16 %v1494_v63, %v1494_v63  ;;  %v1328_v11 = vpop.f32.mrb[28].mxu1 }
 0x25d   : > { %v1330_v10 = vpop.f32.mrb[29].mxu1  ;;  %v1445_v30 = vmax.f32 %v1328_v11, 0.0 }
 0x25e   : > { %v1332_v44 = vpop.f32.mrb[30].mxu1  ;;  %1565 = vmatprep.subr.bf16.mxu0 %v1526_v12  ;;  %v1446_v29 = vmax.f32 %v1330_v10, 0.0 }
 0x25f   : > { %v1447_v27 = vmax.f32 %v1332_v44, 0.0  ;;  %v1334_v25 = vpop.f32.mrb[31].mxu1  ;;  %1566 = vmatpush1.bf16.msra.mxu0 %v1525_v19 }
 0x260   : > { %v1448_v38 = vmax.f32 %v1334_v25, 0.0 }
 0x261   : > { %v1495_v13 = vpack.c.bf16 %v1447_v27, %v1445_v30 }
 0x262   : > { %v1496_v20 = vpack.c.bf16 %v1448_v38, %v1446_v29 }
 0x263   : > { %v1527_v7 = vmul.bf16 %v1495_v13, %v1495_v13 }
 0x264   : > { %v1528_v18 = vmul.bf16 %v1496_v20, %v1496_v20  ;;  %v1338_v21 = vpop.f32.mrb[32].mxu1 }
 0x265   : > { %v1340_v8 = vpop.f32.mrb[33].mxu1  ;;  %v1449_v3 = vmax.f32 %v1338_v21, 0.0 }
 0x266   : > { %v1342_v45 = vpop.f32.mrb[34].mxu1  ;;  %1567 = vmatprep.subr.bf16.mxu0 %v1528_v18  ;;  %v1450_v31 = vmax.f32 %v1340_v8, 0.0 }
 0x267   : > { %v1451_v46 = vmax.f32 %v1342_v45, 0.0  ;;  %v1344_v61 = vpop.f32.mrb[35].mxu1  ;;  %1568 = vmatpush1.bf16.msra.mxu0 %v1527_v7 }
 0x268   : > { %v1452_v14 = vmax.f32 %v1344_v61, 0.0 }
 0x269   : > { %v1497_v48 = vpack.c.bf16 %v1451_v46, %v1449_v3 }
 0x26a   : > { %v1498_v36 = vpack.c.bf16 %v1452_v14, %v1450_v31 }
 0x26b   : > { %v1529_v56 = vmul.bf16 %v1497_v48, %v1497_v48 }
 0x26c   : > { %v1530_v42 = vmul.bf16 %v1498_v36, %v1498_v36  ;;  %v1348_v43 = vpop.f32.mrb[36].mxu1 }
 0x26d   : > { %v1350_v47 = vpop.f32.mrb[37].mxu1  ;;  %v1453_v57 = vmax.f32 %v1348_v43, 0.0 }
 0x26e   : > { %v1352_v53 = vpop.f32.mrb[38].mxu1  ;;  %1569 = vmatprep.subr.bf16.mxu0 %v1530_v42  ;;  %v1454_v17 = vmax.f32 %v1350_v47, 0.0 }
 0x26f   : > { %v1455_v33 = vmax.f32 %v1352_v53, 0.0  ;;  %v1354_v58 = vpop.f32.mrb[39].mxu1  ;;  %1570 = vmatpush1.bf16.msra.mxu0 %v1529_v56 }
 0x270   : > { %v1456_v39 = vmax.f32 %v1354_v58, 0.0 }
 0x271   : > { %v1499_v41 = vpack.c.bf16 %v1455_v33, %v1453_v57 }
 0x272   : > { %v1500_v5 = vpack.c.bf16 %v1456_v39, %v1454_v17 }
 0x273   : > { %v1531_v52 = vmul.bf16 %v1499_v41, %v1499_v41 }
 0x274   : > { %v1532_v9 = vmul.bf16 %v1500_v5, %v1500_v5  ;;  %v1358_v24 = vpop.f32.mrb[40].mxu1 }
 0x275   : > { %v1360_v51 = vpop.f32.mrb[41].mxu1  ;;  %v1457_v28 = vmax.f32 %v1358_v24, 0.0 }
 0x276   : > { %v1362_v59 = vpop.f32.mrb[42].mxu1  ;;  %1571 = vmatprep.subr.bf16.mxu0 %v1532_v9  ;;  %v1458_v4 = vmax.f32 %v1360_v51, 0.0 }
 0x277   : > { %v1459_v32 = vmax.f32 %v1362_v59, 0.0  ;;  %v1364_v1 = vpop.f32.mrb[43].mxu1  ;;  %1572 = vmatpush1.bf16.msra.mxu0 %v1531_v52 }
 0x278   : > { %v1460_v2 = vmax.f32 %v1364_v1, 0.0 }
 0x279   : > { %v1501_v6 = vpack.c.bf16 %v1459_v32, %v1457_v28 }
 0x27a   : > { %v1502_v40 = vpack.c.bf16 %v1460_v2, %v1458_v4 }
 0x27b   : > { %v1533_v54 = vmul.bf16 %v1501_v6, %v1501_v6 }
 0x27c   : > { %v1534_v37 = vmul.bf16 %v1502_v40, %v1502_v40  ;;  %v1368_v26 = vpop.f32.mrb[44].mxu1 }
 0x27d   : > { %v1370_v23 = vpop.f32.mrb[45].mxu1  ;;  %v1461_v60 = vmax.f32 %v1368_v26, 0.0 }
 0x27e   : > { %v1372_v15 = vpop.f32.mrb[46].mxu1  ;;  %1573 = vmatprep.subr.bf16.mxu0 %v1534_v37  ;;  %v1462_v11 = vmax.f32 %v1370_v23, 0.0 }
 0x27f   : > { %v1463_v63 = vmax.f32 %v1372_v15, 0.0  ;;  %v1374_v12 = vpop.f32.mrb[47].mxu1  ;;  %1574 = vmatpush1.bf16.msra.mxu0 %v1533_v54 }
 0x280   : > { %v1464_v19 = vmax.f32 %v1374_v12, 0.0 }
 0x281   : > { %v1503_v10 = vpack.c.bf16 %v1463_v63, %v1461_v60 }
 0x282   : > { %v1504_v44 = vpack.c.bf16 %v1464_v19, %v1462_v11 }
 0x283   : > { %v1535_v25 = vmul.bf16 %v1503_v10, %v1503_v10 }
 0x284   : > { %v1536_v30 = vmul.bf16 %v1504_v44, %v1504_v44  ;;  %v1378_v27 = vpop.f32.mrb[48].mxu1 }
 0x285   : > { %v1380_v29 = vpop.f32.mrb[49].mxu1  ;;  %v1465_v13 = vmax.f32 %v1378_v27, 0.0 }
 0x286   : > { %v1382_v38 = vpop.f32.mrb[50].mxu1  ;;  %1575 = vmatprep.subr.bf16.mxu0 %v1536_v30  ;;  %v1466_v21 = vmax.f32 %v1380_v29, 0.0 }
 0x287   : > { %v1467_v20 = vmax.f32 %v1382_v38, 0.0  ;;  %v1384_v18 = vpop.f32.mrb[51].mxu1  ;;  %1576 = vmatpush1.bf16.msra.mxu0 %v1535_v25 }
 0x288   : > { %v1468_v7 = vmax.f32 %v1384_v18, 0.0 }
 0x289   : > { %v1505_v8 = vpack.c.bf16 %v1467_v20, %v1465_v13 }
 0x28a   : > { %v1506_v45 = vpack.c.bf16 %v1468_v7, %v1466_v21 }
 0x28b   : > { %v1537_v61 = vmul.bf16 %v1505_v8, %v1505_v8 }
 0x28c   : > { %v1538_v3 = vmul.bf16 %v1506_v45, %v1506_v45  ;;  %v1388_v46 = vpop.f32.mrb[52].mxu1 }
 0x28d   : > { %v1390_v31 = vpop.f32.mrb[53].mxu1  ;;  %v1469_v48 = vmax.f32 %v1388_v46, 0.0 }
 0x28e   : > { %v1392_v14 = vpop.f32.mrb[54].mxu1  ;;  %1577 = vmatprep.subr.bf16.mxu0 %v1538_v3  ;;  %v1470_v43 = vmax.f32 %v1390_v31, 0.0 }
 0x28f   : > { %v1471_v36 = vmax.f32 %v1392_v14, 0.0  ;;  %v1394_v42 = vpop.f32.mrb[55].mxu1  ;;  %1578 = vmatpush1.bf16.msra.mxu0 %v1537_v61 }
 0x290   : > { %v1472_v56 = vmax.f32 %v1394_v42, 0.0 }
 0x291   : > { %v1507_v47 = vpack.c.bf16 %v1471_v36, %v1469_v48 }
 0x292   : > { %v1508_v53 = vpack.c.bf16 %v1472_v56, %v1470_v43 }
 0x293   : > { %v1539_v58 = vmul.bf16 %v1507_v47, %v1507_v47 }
 0x294   : > { %v1540_v57 = vmul.bf16 %v1508_v53, %v1508_v53  ;;  %v1398_v33 = vpop.f32.mrb[56].mxu1 }
 0x295   : > { %v1400_v17 = vpop.f32.mrb[57].mxu1  ;;  %v1473_v41 = vmax.f32 %v1398_v33, 0.0 }
 0x296   : > { %v1402_v39 = vpop.f32.mrb[58].mxu1  ;;  %1579 = vmatprep.subr.bf16.mxu0 %v1540_v57  ;;  %v1474_v24 = vmax.f32 %v1400_v17, 0.0 }
 0x297   : > { %v1475_v5 = vmax.f32 %v1402_v39, 0.0  ;;  %v1404_v9 = vpop.f32.mrb[59].mxu1  ;;  %1580 = vmatpush1.bf16.msra.mxu0 %v1539_v58 }
 0x298   : > { %v1476_v52 = vmax.f32 %v1404_v9, 0.0 }
 0x299   : > { %v1509_v51 = vpack.c.bf16 %v1475_v5, %v1473_v41 }
 0x29a   : > { %v1510_v59 = vpack.c.bf16 %v1476_v52, %v1474_v24 }
 0x29b   : > { %v1541_v1 = vmul.bf16 %v1509_v51, %v1509_v51 }
 0x29c   : > { %v1542_v28 = vmul.bf16 %v1510_v59, %v1510_v59  ;;  %v1408_v32 = vpop.f32.mrb[60].mxu1 }
 0x29d   : > { %v1410_v4 = vpop.f32.mrb[61].mxu1  ;;  %v1477_v6 = vmax.f32 %v1408_v32, 0.0 }
 0x29e   : > { %v1412_v2 = vpop.f32.mrb[62].mxu1  ;;  %1581 = vmatprep.subr.bf16.mxu0 %v1542_v28  ;;  %v1478_v26 = vmax.f32 %v1410_v4, 0.0 }
 0x29f   : > { %v1479_v40 = vmax.f32 %v1412_v2, 0.0  ;;  %v1414_v37 = vpop.f32.mrb[63].mxu1  ;;  %1582 = vmatpush1.bf16.msra.mxu0 %v1541_v1 }
 0x2a0   : > { %v1480_v54 = vmax.f32 %v1414_v37, 0.0 }
 0x2a1   : > { %v1511_v23 = vpack.c.bf16 %v1479_v40, %v1477_v6 }
 0x2a2   : > { %v1512_v15 = vpack.c.bf16 %v1480_v54, %v1478_v26 }
 0x2a3   : > { %v1543_v63 = vmul.bf16 %v1511_v23, %v1511_v23 }
 0x2a4   : > { %v1544_v60 = vmul.bf16 %v1512_v15, %v1512_v15 }
 0x2a6   : > { %1583 = vmatprep.subr.bf16.mxu0 %v1544_v60 }
 0x2a7   : > { %1584 = vmatpush1.bf16.msra.mxu0 %v1543_v63 }
 0x2aa   : > { %1586 = vmatmul.mubr.bf16.vlgmr.msra.gmra.mrb[8].mxu0 %v1115_v35 }
 0x2ab   : > { %1595 = vmatprep.mubr.bf16.mxu0 %v1118_v34 }
 0x2b2   : > { %1596 = vmatmul.mubr.bf16.gmra.mrb[12].mxu0 %v1117_v22 }
 0x2b3   : > { %1986 = shalt.err (!%p1983_p5)
}
 0x2b4   : > { %s1987_s23 = scalar_lea.hbm %s2573_s8, 1024  ;;  %s1991_s16 = scalar_lea.hbm %s2672_s7, 2048 }
 0x2b5   : > { %p1988_p6 = scmp.ne.s32.totalorder %s2573_s8, %s1987_s23  ;;  %p1992_p10 = scmp.lt.u32.totalorder %s2573_s8, %s2672_s7 }
 0x2b6   : > { %p1993_p11 = scmp.lt.u32.totalorder %s1991_s16, %s1987_s23  ;;  %p1995_p13 = scmp.lt.u32.totalorder %s1987_s23, %s2573_s8 }
 0x2b7   : > { %p1989_p7 = pnand %p1988_p6, %p2174_p4 }
 0x2b8   : > { %p1994_p12 = por %p1993_p11, %p1992_p10 }
 0x2b9   : > { %p1990_p9 = pneg %p1989_p7 }
 0x2ba   : > { %p1996_p0 = por %p1995_p13, %p1994_p12 }
 0x2bc   : > { %p1997_p1 = pnand %p1996_p0, %p1990_p9 }
 0x2be   : > { %2000 = shalt.err (!%p1997_p1)
}
 0x2bf   : > { %s2674_s15 = smov 256   ;;  %s2092_s20 = smov 16  }
 0x2c0   : > { %1875 = dma.vmem_to_hbm [thread:$0]  (%p2174_p4), %s2576_s10, 1024, %s2573_s8, %s1647_s12, %s2674_s15, %s2674_s15, %s2092_s20  }
 0x2c1   : > { %s345_s21 = scalar_lea.vmem [#allocation6], %s1828_s18  ;;  %s2677_s18 = sshll.u32 %s2075_s27, 10 }
 0x2c2   : > { %s1662_s23 = sshll.u32 %s345_s21, 4  ;;  %s2614_s12 = scalar_lea.hbm %s2671_s6, %s2677_s18  ;;  %s2607_s23 = int_to_ptr.vmem [resolvable:$true] %s1662_s23 }
 0x2c3   : > { %s1642_s22 = scalar_lea.sflag [#allocation7], %s2411_s17  ;;  %s2001_s30 = scalar_lea.vmem %s2607_s23, 1024 }
 0x2c4   : > { %p2002_p2 = scmp.ne.s32.totalorder %s2607_s23, %s2001_s30  ;;  %s2093_s16 = smov [#allocation6]  }
 0x2c5   : > { %s2005_s19 = sshll.u32 %s2093_s16, 4  ;;  %s2006_s19 = int_to_ptr.vmem [resolvable:$false] %s2005_s19 }
 0x2c6   : > { %p2003_p3 = pnand %p2002_p2, %p2174_p4  ;;  %s2007_s15 = scalar_lea.vmem %s2006_s19, 2048 }
 0x2c7   : > { %p2008_p6 = scmp.lt.s32.totalorder %s2607_s23, %s2006_s19  ;;  %p2009_p7 = scmp.lt.s32.totalorder %s2007_s15, %s2001_s30 }
 0x2c8   : > { %p2004_p5 = pneg %p2003_p3 }
 0x2c9   : > { %p2010_p9 = por %p2009_p7, %p2008_p6 }
 0x2cb   : > { %p2011_p10 = pnand %p2010_p9, %p2004_p5 }
 0x37d   : > { %v1587_v55 = vpop.f32.mrb[8].mxu0 }
 0x37e   : > { %1633 = vst [vmem:[%s345_s21] sm:$0xff] %v1587_v55  ;;  %v1589_v62 = vpop.f32.mrb[9].mxu0 }
 0x37f   : > { %1634 = vst [vmem:[%s345_s21 + $0x8] sm:$0xff] %v1589_v62  ;;  %v1591_v35 = vpop.f32.mrb[10].mxu0 }
 0x380   : > { %1635 = vst [vmem:[%s345_s21 + $0x10] sm:$0xff] %v1591_v35  ;;  %v1593_v49 = vpop.f32.mrb[11].mxu0 }
 0x381   : > { %1636 = vst [vmem:[%s345_s21 + $0x18] sm:$0xff] %v1593_v49 }
 0x385   : > { %v1597_v50 = vpop.f32.mrb[12].mxu0 }
 0x386   : > { %1637 = vst [vmem:[%s345_s21 + $0x20] sm:$0xff] %v1597_v50  ;;  %v1599_v16 = vpop.f32.mrb[13].mxu0 }
 0x387   : > { %1638 = vst [vmem:[%s345_s21 + $0x28] sm:$0xff] %v1599_v16  ;;  %v1601_v0 = vpop.f32.mrb[14].mxu0 }
 0x388   : > { %1639 = vst [vmem:[%s345_s21 + $0x30] sm:$0xff] %v1601_v0  ;;  %v1603_v22 = vpop.f32.mrb[15].mxu0 }
 0x389   : > { %1640 = vst [vmem:[%s345_s21 + $0x38] sm:$0xff] %v1603_v22 }
 0x38a   : > { %2014 = shalt.err (!%p2011_p10)
}
 0x38b   : > { %s2015_s27 = scalar_lea.hbm %s2614_s12, 1024  ;;  %s2019_s8 = scalar_lea.hbm %s2671_s6, 2048 }
 0x38c   : > { %p2016_p11 = scmp.ne.s32.totalorder %s2614_s12, %s2015_s27  ;;  %p2020_p0 = scmp.lt.u32.totalorder %s2614_s12, %s2671_s6 }
 0x38d   : > { %p2021_p1 = scmp.lt.u32.totalorder %s2019_s8, %s2015_s27  ;;  %p2023_p3 = scmp.lt.u32.totalorder %s2015_s27, %s2614_s12 }
 0x38e   : > { %p2017_p12 = pnand %p2016_p11, %p2174_p4 }
 0x38f   : > { %p2022_p2 = por %p2021_p1, %p2020_p0 }
 0x390   : > { %p2018_p13 = pneg %p2017_p12 }
 0x391   : > { %p2024_p5 = por %p2023_p3, %p2022_p2 }
 0x393   : > { %p2025_p6 = pnand %p2024_p5, %p2018_p13 }
 0x395   : > { %2028 = shalt.err (!%p2025_p6)
}
 0x396   : > { %s2678_s15 = smov 256  }
 0x397   : > { %1874 = dma.vmem_to_hbm [thread:$0]  (%p2174_p4), %s2607_s23, 1024, %s2614_s12, %s1642_s22, %s2678_s15, %s2678_s15, %s2092_s20  }
 0x398 PF: > { %p1885_p7 = scmp.ge.s32.totalorder %s2083_s29, 2  ;;  %s1695_s30 = sand.u32 1, %s2063_s24  }
 0x399   : > { %s1696_s19 = scalar_lea.sflag [#allocation7], %s1695_s30 }
 0x39a   : > { %p1879_p9 = pnand %p1885_p7, %p2181_p8 }
 0x39c   : > { %2054 = dma.done.wait (!%p1879_p9), %s1696_s19, 1024  }
 0x39d   : > { %2056 = vsyncadd (!%p1879_p9), %s1696_s19, 4294966272  ;;  %s1705_s11 = scalar_lea.sflag [#allocation9], %s1695_s30 }
 0x39e   : > { %2058 = dma.done.wait (!%p1879_p9), %s1705_s11, 1024  }
 0x39f   : > { %2060 = vsyncadd (!%p1879_p9), %s1705_s11, 4294966272  ;;  %s24_s29 = sadd.s32 1, %s2083_s29   ;;  %s2679_s24 = smov %s2067_s25 }
 0x3a0   : > { %p21_p10 = scmp.ge.s32.totalorder %s24_s29, 4   ;;  %s2680_s25 = smov %s2071_s26 }
 0x3a1   : > { %s2681_s26 = smov %s2187_s14  ;;  %s2682_s27 = smov %s2079_s28 }
 0x3a2   : > { %s2683_s28 = smov %s2685_s9  ;;  %23 = sbr.rel (!%p21_p10) target bundleno = 6 (0x6), region = 115 }
 0x3a9   :  { %1710 = vsyncpa [#allocation7], 1 }
 0x3aa   :  { %1712 = vsyncpa [#allocation7 + $0x1], 1 }
 0x3ab   :  { %1713 = vsyncpa [#allocation9], 1 }
 0x3ac   :  { %1715 = vsyncpa [#allocation9 + $0x1], 1 }

</bundles_post_ra>
